<compile_context>
chip_gen: v7x
topology: tpu7x:2x2x1
jax: 0.10.0
libtpu: 0.0.40
codegen_flags: <defaults>
</compile_context>

<pallas_src>
import functools

import jax
import jax.numpy as jnp
import numpy as np
from jax.experimental import pallas as pl
from jax.experimental.pallas import tpu as pltpu

LANE = 128
_VMEM_BUDGET = 20 * 1024 * 1024   # working-set cap; safe on v5e/v6e/v7x


def _round_up(x, m):
    return ((x + m - 1) // m) * m


# ----------------------------- Pallas kernel --------------------------------
def matmul_bias_act_kernel(x_ref, w_ref, b_ref, o_ref, *, apply_relu):
    # x_ref: (TR, Cin)     rows of NHWC-flattened features
    # w_ref: (Cin, CoutP)  1x1-conv weight (BN scale pre-folded), lane-padded
    # b_ref: (1, CoutP)    folded BN bias (zeros for a plain conv)
    y = jnp.dot(x_ref[...], w_ref[...], preferred_element_type=jnp.float32)
    y = y + b_ref[...]
    if apply_relu:
        y = jnp.maximum(y, 0.0)
    o_ref[...] = y.astype(o_ref.dtype)


def conv1x1_rows(x_mat, w_t, bias, *, apply_relu, tile_rows=1024):
    """x_mat: (N, Cin) f32 ; w_t: (Cin, Cout) ; bias: (1, Cout) -> (N, Cout)."""
    n, cin = x_mat.shape
    cout = w_t.shape[1]

    # Lane-dense output: pad weight/bias columns to a multiple of 128 so every
    # store is an unmasked full-lane vst; padded columns are sliced off below.
    cout_p = _round_up(cout, LANE)
    if cout_p != cout:
        w_t = jnp.pad(w_t, ((0, 0), (0, cout_p - cout)))
        bias = jnp.pad(bias, ((0, 0), (0, cout_p - cout)))

    # Row tile: cover the whole matrix in one block when it is small,
    # otherwise keep the double-buffered in/out tiles + resident weight under
    # the VMEM budget (re-derived per call; conservative for v7x's 64 MiB).
    tr = min(_round_up(tile_rows, 8), _round_up(n, 8))

    def working_set(t):
        return 4 * (2 * t * cin + 2 * t * cout_p + cin * cout_p + cout_p)

    while tr > 8 and working_set(tr) > _VMEM_BUDGET:
        tr = _round_up(max(8, tr // 2), 8)

    grid = (pl.cdiv(n, tr),)   # ragged last block handled by Pallas; no jnp.pad

    out = pl.pallas_call(
        functools.partial(matmul_bias_act_kernel, apply_relu=apply_relu),
        out_shape=jax.ShapeDtypeStruct((n, cout_p), jnp.float32),
        grid_spec=pltpu.PrefetchScalarGridSpec(
            num_scalar_prefetch=0,
            grid=grid,
            in_specs=[
                pl.BlockSpec((tr, cin), lambda i: (i, 0)),
                pl.BlockSpec((cin, cout_p), lambda i: (0, 0)),
                pl.BlockSpec((1, cout_p), lambda i: (0, 0)),
            ],
            out_specs=pl.BlockSpec((tr, cout_p), lambda i: (i, 0)),
        ),
        compiler_params=pltpu.CompilerParams(
            dimension_semantics=("parallel",),
            vmem_limit_bytes=32 * 1024 * 1024,
        ),
    )(x_mat, w_t, bias)
    return out[:, :cout] if cout_p != cout else out


def conv1x1_nhwc(x_nhwc, w_t, bias, *, apply_relu):
    b, h, w, cin = x_nhwc.shape
    y = conv1x1_rows(x_nhwc.reshape(-1, cin), w_t, bias, apply_relu=apply_relu)
    return y.reshape(b, h, w, -1)


# ---------------------- weight / BN preparation (host-side) -----------------
def _blocked_perm(n_complex):
    # column j of the blocked [real | imag] layout <- PyTorch interleaved ch.
    j = np.arange(2 * n_complex)
    return (j % n_complex) * 2 + (j // n_complex)


def conv_bn_params(conv_w, gamma, beta, mean, var, eps=1e-5):
    """Plain 1x1 conv + inference BN -> (w_t with scale folded, bias)."""
    cout, cin = conv_w.shape[0], conv_w.shape[1]
    w_t = conv_w.reshape(cout, cin).T
    scale = gamma / jnp.sqrt(var + eps)
    bias = beta - mean * scale
    return w_t * scale[None, :], bias[None, :]


def fourier_unit_params(conv_w, gamma, beta, mean, var, eps=1e-5):
    """FourierUnit conv + BN: permute the PyTorch-interleaved (re,im,re,im,..)
    channels into blocked [real|imag] order and fold the inference BN."""
    cout2, cin2 = conv_w.shape[0], conv_w.shape[1]
    w2d = conv_w.reshape(cout2, cin2)
    perm_in = _blocked_perm(cin2 // 2)
    perm_out = _blocked_perm(cout2 // 2)
    w_t = w2d[perm_out][:, perm_in].T                     # (cin2, cout2) blocked
    scale = (gamma / jnp.sqrt(var + eps))
    bias = (beta - mean * scale)
    scale_b = scale[perm_out]
    bias_b = bias[perm_out]
    return w_t * scale_b[None, :], bias_b[None, :]


# ----------------------------- FourierUnit (NHWC) ----------------------------
def fourier_unit_nhwc(x_nhwc, w_t, bias, cout2):
    """x_nhwc: (B,H,W,C) real.  w_t/bias are in blocked [real|imag] order."""
    b, h, w, c = x_nhwc.shape
    # TODO(synk): FFT / iFFT have no Pallas TPU primitive; they remain jnp.fft.
    ffted = jnp.fft.rfftn(x_nhwc, axes=(1, 2), norm="ortho")    # (B,H,Wf,C) c64
    wf = ffted.shape[2]
    feat = jnp.concatenate([ffted.real, ffted.imag], axis=-1)   # (B,H,Wf,2C)
    y = conv1x1_rows(feat.reshape(-1, 2 * c), w_t, bias, apply_relu=True)
    y = y.reshape(b, h, wf, cout2)
    cout = cout2 // 2
    y_c = jax.lax.complex(y[..., :cout], y[..., cout:])
    return jnp.fft.irfftn(y_c, s=(h, w), axes=(1, 2), norm="ortho")


# -------------------------- SpectralTransform forward ------------------------
@jax.jit
def spectral_transform_forward(x_nchw, params):
    """x: (B, Cin, H, W) NCHW, like the PyTorch module (stride=1, lfu=True)."""
    x = jnp.transpose(x_nchw, (0, 2, 3, 1))                     # NHWC
    b, h, w, _ = x.shape

    # conv1: 1x1 conv + BN + ReLU
    w1_t, b1 = conv_bn_params(params["conv1_w"], params["bn1_g"], params["bn1_b"],
                              params["bn1_m"], params["bn1_v"])
    x1 = conv1x1_nhwc(x, w1_t, b1, apply_relu=True)             # (B,H,W, Cout//2)
    c = x1.shape[-1]

    # global Fourier unit
    wfu_t, bfu = fourier_unit_params(params["fu_w"], params["fu_g"], params["fu_b"],
                                     params["fu_m"], params["fu_v"])
    fu_out = fourier_unit_nhwc(x1, wfu_t, bfu, cout2=2 * c)

    # local Fourier unit: 2x2 spatial split of the first c//4 channels
    hs, ws = h // 2, w // 2
    xs = x1[..., : c // 4]
    xs = jnp.concatenate([xs[:, :hs], xs[:, hs:]], axis=-1)      # split H -> ch
    xs = jnp.concatenate([xs[:, :, :ws], xs[:, :, ws:]], axis=-1)  # split W -> ch
    wlfu_t, blfu = fourier_unit_params(params["lfu_w"], params["lfu_g"],
                                       params["lfu_b"], params["lfu_m"],
                                       params["lfu_v"])
    xs = fourier_unit_nhwc(xs, wlfu_t, blfu, cout2=2 * c)
    xs = jnp.tile(xs, (1, 2, 2, 1))

    # conv2: plain 1x1 conv (no BN / ReLU / bias)
    cout = params["conv2_w"].shape[0]
    w2_t = params["conv2_w"].reshape(cout, c).T
    zero_bias = jnp.zeros((1, cout), jnp.float32)
    out = conv1x1_nhwc(x1 + fu_out + xs, w2_t, zero_bias, apply_relu=False)
    return jnp.transpose(out, (0, 3, 1, 2))                     # NCHW


# ----------------------------- pure-JAX reference ----------------------------
def _fourier_unit_ref(x, conv_w, gamma, beta, mean, var, eps=1e-5):
    b, c, h, w = x.shape
    ffted = jnp.fft.rfftn(x, axes=(-2, -1), norm="ortho")
    wf = ffted.shape[-1]
    ffted = jnp.stack((ffted.real, ffted.imag), axis=-1)
    ffted = jnp.transpose(ffted, (0, 1, 4, 2, 3)).reshape(b, 2 * c, h, wf)
    cout2 = conv_w.shape[0]
    y = jnp.einsum("bihw,oi->bohw", ffted, conv_w.reshape(cout2, 2 * c))
    scale = gamma / jnp.sqrt(var + eps)
    y = y * scale[None, :, None, None] + (beta - mean * scale)[None, :, None, None]
    y = jnp.maximum(y, 0.0)
    cout = cout2 // 2
    y = jnp.transpose(y.reshape(b, cout, 2, h, wf), (0, 1, 3, 4, 2))
    y_c = jax.lax.complex(y[..., 0], y[..., 1])
    return jnp.fft.irfftn(y_c, s=(h, w), axes=(-2, -1), norm="ortho")


def spectral_transform_reference(x, params, eps=1e-5):
    c1 = params["conv1_w"]
    y = jnp.einsum("bihw,oi->bohw", x, c1.reshape(c1.shape[0], c1.shape[1]))
    scale = params["bn1_g"] / jnp.sqrt(params["bn1_v"] + eps)
    y = y * scale[None, :, None, None] + \
        (params["bn1_b"] - params["bn1_m"] * scale)[None, :, None, None]
    x1 = jnp.maximum(y, 0.0)

    fu_out = _fourier_unit_ref(x1, params["fu_w"], params["fu_g"], params["fu_b"],
                               params["fu_m"], params["fu_v"])

    n, c, h, w = x1.shape
    hs, ws = h // 2, w // 2
    xs = x1[:, : c // 4]
    xs = jnp.concatenate([xs[:, :, :hs], xs[:, :, hs:]], axis=1)
    xs = jnp.concatenate([xs[:, :, :, :ws], xs[:, :, :, ws:]], axis=1)
    xs = _fourier_unit_ref(xs, params["lfu_w"], params["lfu_g"], params["lfu_b"],
                           params["lfu_m"], params["lfu_v"])
    xs = jnp.tile(xs, (1, 1, 2, 2))

    c2 = params["conv2_w"]
    return jnp.einsum("bihw,oi->bohw", x1 + fu_out + xs,
                      c2.reshape(c2.shape[0], c2.shape[1]))


# ---------------------------------- main -------------------------------------
if __name__ == "__main__":
    key = jax.random.PRNGKey(0)
    ks = jax.random.split(key, 18)

    B, C_in, C_out, H, W = 2, 4, 8, 16, 16
    Ch = C_out // 2                       # hidden channels after conv1

    x = jax.random.normal(ks[0], (B, C_in, H, W), dtype=jnp.float32)

    params = {
        # conv1: Conv2d(C_in, C_out//2, k=1, bias=False) + BatchNorm2d
        "conv1_w": 0.2 * jax.random.normal(ks[1], (Ch, C_in, 1, 1), jnp.float32),
        "bn1_g": 1.0 + 0.1 * jax.random.normal(ks[2], (Ch,), jnp.float32),
        "bn1_b": 0.1 * jax.random.normal(ks[3], (Ch,), jnp.float32),
        "bn1_m": 0.1 * jax.random.normal(ks[4], (Ch,), jnp.float32),
        "bn1_v": 0.5 + jax.random.uniform(ks[5], (Ch,), jnp.float32),
        # fu: FourierUnit(Ch, Ch): Conv2d(2*Ch, 2*Ch, k=1, bias=False) + BN
        "fu_w": 0.1 * jax.random.normal(ks[6], (2 * Ch, 2 * Ch, 1, 1), jnp.float32),
        "fu_g": 1.0 + 0.1 * jax.random.normal(ks[7], (2 * Ch,), jnp.float32),
        "fu_b": 0.1 * jax.random.normal(ks[8], (2 * Ch,), jnp.float32),
        "fu_m": 0.1 * jax.random.normal(ks[9], (2 * Ch,), jnp.float32),
        "fu_v": 0.5 + jax.random.uniform(ks[10], (2 * Ch,), jnp.float32),
        # lfu: same shapes as fu
        "lfu_w": 0.1 * jax.random.normal(ks[11], (2 * Ch, 2 * Ch, 1, 1), jnp.float32),
        "lfu_g": 1.0 + 0.1 * jax.random.normal(ks[12], (2 * Ch,), jnp.float32),
        "lfu_b": 0.1 * jax.random.normal(ks[13], (2 * Ch,), jnp.float32),
        "lfu_m": 0.1 * jax.random.normal(ks[14], (2 * Ch,), jnp.float32),
        "lfu_v": 0.5 + jax.random.uniform(ks[15], (2 * Ch,), jnp.float32),
        # conv2: Conv2d(C_out//2, C_out, k=1, bias=False)
        "conv2_w": 0.2 * jax.random.normal(ks[16], (C_out, Ch, 1, 1), jnp.float32),
    }

    out = jax.block_until_ready(spectral_transform_forward(x, params))
    ref = jax.block_until_ready(spectral_transform_reference(x, params))

    np.testing.assert_allclose(np.asarray(out), np.asarray(ref),
                               rtol=1e-4, atol=1e-4)
    assert out.shape == (B, C_out, H, W)
    print("KERNEL_OK")
</pallas_src>

<mosaic_0001>
module attributes {stable_mosaic.version = 11 : i64} {
  func.func @matmul_bias_act_kernel(%arg0: i32, %arg1: memref<512x4xf32, #tpu.memory_space<vmem>>, %arg2: memref<4x128xf32, #tpu.memory_space<vmem>>, %arg3: memref<1x128xf32, #tpu.memory_space<vmem>>, %arg4: memref<512x128xf32, #tpu.memory_space<vmem>>) attributes {dimension_semantics = [#tpu.dimension_semantics<parallel>], iteration_bounds = array<i64: 1>, scalar_prefetch = 0 : i64, scratch_operands = 0 : i64, tpu.core_type = #tpu.core_type<tc>, window_params = [{transform_indices = @transform_0, window_bounds = array<i64: 512, 4>}, {pipeline_mode = #tpu.pipeline_mode<synchronous>, transform_indices = @transform_1, window_bounds = array<i64: 4, 128>}, {pipeline_mode = #tpu.pipeline_mode<synchronous>, transform_indices = @transform_2, window_bounds = array<i64: 1, 128>}, {transform_indices = @transform_3, window_bounds = array<i64: 512, 128>}]} {
    %c0 = arith.constant 0 : index
    %c0_0 = arith.constant 0 : index
    %0 = vector.load %arg1[%c0, %c0_0] : memref<512x4xf32, #tpu.memory_space<vmem>>, vector<512x4xf32>
    %c0_1 = arith.constant 0 : index
    %c0_2 = arith.constant 0 : index
    %1 = vector.load %arg2[%c0_1, %c0_2] : memref<4x128xf32, #tpu.memory_space<vmem>>, vector<4x128xf32>
    %cst = arith.constant dense<0.000000e+00> : vector<512x128xf32>
    %2 = tpu.matmul %0, %1, %cst {dimension_numbers = #tpu.dot_dimension_numbers<[1], [0], [0], [1], [0, 0, 1, 1], [], []>} : vector<512x4xf32>, vector<4x128xf32>, vector<512x128xf32> -> vector<512x128xf32>
    %c0_3 = arith.constant 0 : index
    %c0_4 = arith.constant 0 : index
    %3 = vector.load %arg3[%c0_3, %c0_4] : memref<1x128xf32, #tpu.memory_space<vmem>>, vector<1x128xf32>
    %4 = vector.broadcast %3 : vector<1x128xf32> to vector<512x128xf32>
    %5 = arith.addf %2, %4 : vector<512x128xf32>
    %cst_5 = arith.constant 0.000000e+00 : f32
    %6 = vector.broadcast %cst_5 : f32 to vector<512x128xf32>
    %7 = arith.maximumf %5, %6 : vector<512x128xf32>
    %c0_6 = arith.constant 0 : index
    %c0_7 = arith.constant 0 : index
    %8 = vector.load %arg4[%c0_6, %c0_7] : memref<512x128xf32, #tpu.memory_space<vmem>>, vector<512x128xf32>
    tpu.vector_store %arg4[%c0_6, %c0_7], %7 {strides = array<i32>} : memref<512x128xf32, #tpu.memory_space<vmem>>, vector<512x128xf32>,
    return
  }
  func.func @transform_0(%arg0: i32) -> (i32, i32) {
    %c0_i32 = arith.constant 0 : i32
    %c0_i32_0 = arith.constant 0 : i32
    return %arg0, %c0_i32 : i32, i32
  }
  func.func @transform_1(%arg0: i32) -> (i32, i32) {
    %c0_i32 = arith.constant 0 : i32
    %c0_i32_0 = arith.constant 0 : i32
    %c0_i32_1 = arith.constant 0 : i32
    return %c0_i32, %c0_i32_0 : i32, i32
  }
  func.func @transform_2(%arg0: i32) -> (i32, i32) {
    %c0_i32 = arith.constant 0 : i32
    %c0_i32_0 = arith.constant 0 : i32
    %c0_i32_1 = arith.constant 0 : i32
    return %c0_i32, %c0_i32_0 : i32, i32
  }
  func.func @transform_3(%arg0: i32) -> (i32, i32) {
    %c0_i32 = arith.constant 0 : i32
    %c0_i32_0 = arith.constant 0 : i32
    return %arg0, %c0_i32 : i32, i32
  }
}

module attributes {stable_mosaic.version = 11 : i64} {
  func.func @matmul_bias_act_kernel(%arg0: i32, %arg1: memref<288x8xf32, #tpu.memory_space<vmem>>, %arg2: memref<8x128xf32, #tpu.memory_space<vmem>>, %arg3: memref<1x128xf32, #tpu.memory_space<vmem>>, %arg4: memref<288x128xf32, #tpu.memory_space<vmem>>) attributes {dimension_semantics = [#tpu.dimension_semantics<parallel>], iteration_bounds = array<i64: 1>, scalar_prefetch = 0 : i64, scratch_operands = 0 : i64, tpu.core_type = #tpu.core_type<tc>, window_params = [{transform_indices = @transform_0, window_bounds = array<i64: 288, 8>}, {pipeline_mode = #tpu.pipeline_mode<synchronous>, transform_indices = @transform_1, window_bounds = array<i64: 8, 128>}, {pipeline_mode = #tpu.pipeline_mode<synchronous>, transform_indices = @transform_2, window_bounds = array<i64: 1, 128>}, {transform_indices = @transform_3, window_bounds = array<i64: 288, 128>}]} {
    %c0 = arith.constant 0 : index
    %c0_0 = arith.constant 0 : index
    %0 = vector.load %arg1[%c0, %c0_0] : memref<288x8xf32, #tpu.memory_space<vmem>>, vector<288x8xf32>
    %c0_1 = arith.constant 0 : index
    %c0_2 = arith.constant 0 : index
    %1 = vector.load %arg2[%c0_1, %c0_2] : memref<8x128xf32, #tpu.memory_space<vmem>>, vector<8x128xf32>
    %cst = arith.constant dense<0.000000e+00> : vector<288x128xf32>
    %2 = tpu.matmul %0, %1, %cst {dimension_numbers = #tpu.dot_dimension_numbers<[1], [0], [0], [1], [0, 0, 1, 1], [], []>} : vector<288x8xf32>, vector<8x128xf32>, vector<288x128xf32> -> vector<288x128xf32>
    %c0_3 = arith.constant 0 : index
    %c0_4 = arith.constant 0 : index
    %3 = vector.load %arg3[%c0_3, %c0_4] : memref<1x128xf32, #tpu.memory_space<vmem>>, vector<1x128xf32>
    %4 = vector.broadcast %3 : vector<1x128xf32> to vector<288x128xf32>
    %5 = arith.addf %2, %4 : vector<288x128xf32>
    %cst_5 = arith.constant 0.000000e+00 : f32
    %6 = vector.broadcast %cst_5 : f32 to vector<288x128xf32>
    %7 = arith.maximumf %5, %6 : vector<288x128xf32>
    %c0_6 = arith.constant 0 : index
    %c0_7 = arith.constant 0 : index
    %8 = vector.load %arg4[%c0_6, %c0_7] : memref<288x128xf32, #tpu.memory_space<vmem>>, vector<288x128xf32>
    tpu.vector_store %arg4[%c0_6, %c0_7], %7 {strides = array<i32>} : memref<288x128xf32, #tpu.memory_space<vmem>>, vector<288x128xf32>,
    return
  }
  func.func @transform_0(%arg0: i32) -> (i32, i32) {
    %c0_i32 = arith.constant 0 : i32
    %c0_i32_0 = arith.constant 0 : i32
    return %arg0, %c0_i32 : i32, i32
  }
  func.func @transform_1(%arg0: i32) -> (i32, i32) {
    %c0_i32 = arith.constant 0 : i32
    %c0_i32_0 = arith.constant 0 : i32
    %c0_i32_1 = arith.constant 0 : i32
    return %c0_i32, %c0_i32_0 : i32, i32
  }
  func.func @transform_2(%arg0: i32) -> (i32, i32) {
    %c0_i32 = arith.constant 0 : i32
    %c0_i32_0 = arith.constant 0 : i32
    %c0_i32_1 = arith.constant 0 : i32
    return %c0_i32, %c0_i32_0 : i32, i32
  }
  func.func @transform_3(%arg0: i32) -> (i32, i32) {
    %c0_i32 = arith.constant 0 : i32
    %c0_i32_0 = arith.constant 0 : i32
    return %arg0, %c0_i32 : i32, i32
  }
}

module attributes {stable_mosaic.version = 11 : i64} {
  func.func @matmul_bias_act_kernel(%arg0: i32, %arg1: memref<80x8xf32, #tpu.memory_space<vmem>>, %arg2: memref<8x128xf32, #tpu.memory_space<vmem>>, %arg3: memref<1x128xf32, #tpu.memory_space<vmem>>, %arg4: memref<80x128xf32, #tpu.memory_space<vmem>>) attributes {dimension_semantics = [#tpu.dimension_semantics<parallel>], iteration_bounds = array<i64: 1>, scalar_prefetch = 0 : i64, scratch_operands = 0 : i64, tpu.core_type = #tpu.core_type<tc>, window_params = [{transform_indices = @transform_0, window_bounds = array<i64: 80, 8>}, {pipeline_mode = #tpu.pipeline_mode<synchronous>, transform_indices = @transform_1, window_bounds = array<i64: 8, 128>}, {pipeline_mode = #tpu.pipeline_mode<synchronous>, transform_indices = @transform_2, window_bounds = array<i64: 1, 128>}, {transform_indices = @transform_3, window_bounds = array<i64: 80, 128>}]} {
    %c0 = arith.constant 0 : index
    %c0_0 = arith.constant 0 : index
    %0 = vector.load %arg1[%c0, %c0_0] : memref<80x8xf32, #tpu.memory_space<vmem>>, vector<80x8xf32>
    %c0_1 = arith.constant 0 : index
    %c0_2 = arith.constant 0 : index
    %1 = vector.load %arg2[%c0_1, %c0_2] : memref<8x128xf32, #tpu.memory_space<vmem>>, vector<8x128xf32>
    %cst = arith.constant dense<0.000000e+00> : vector<80x128xf32>
    %2 = tpu.matmul %0, %1, %cst {dimension_numbers = #tpu.dot_dimension_numbers<[1], [0], [0], [1], [0, 0, 1, 1], [], []>} : vector<80x8xf32>, vector<8x128xf32>, vector<80x128xf32> -> vector<80x128xf32>
    %c0_3 = arith.constant 0 : index
    %c0_4 = arith.constant 0 : index
    %3 = vector.load %arg3[%c0_3, %c0_4] : memref<1x128xf32, #tpu.memory_space<vmem>>, vector<1x128xf32>
    %4 = vector.broadcast %3 : vector<1x128xf32> to vector<80x128xf32>
    %5 = arith.addf %2, %4 : vector<80x128xf32>
    %cst_5 = arith.constant 0.000000e+00 : f32
    %6 = vector.broadcast %cst_5 : f32 to vector<80x128xf32>
    %7 = arith.maximumf %5, %6 : vector<80x128xf32>
    %c0_6 = arith.constant 0 : index
    %c0_7 = arith.constant 0 : index
    %8 = vector.load %arg4[%c0_6, %c0_7] : memref<80x128xf32, #tpu.memory_space<vmem>>, vector<80x128xf32>
    tpu.vector_store %arg4[%c0_6, %c0_7], %7 {strides = array<i32>} : memref<80x128xf32, #tpu.memory_space<vmem>>, vector<80x128xf32>,
    return
  }
  func.func @transform_0(%arg0: i32) -> (i32, i32) {
    %c0_i32 = arith.constant 0 : i32
    %c0_i32_0 = arith.constant 0 : i32
    return %arg0, %c0_i32 : i32, i32
  }
  func.func @transform_1(%arg0: i32) -> (i32, i32) {
    %c0_i32 = arith.constant 0 : i32
    %c0_i32_0 = arith.constant 0 : i32
    %c0_i32_1 = arith.constant 0 : i32
    return %c0_i32, %c0_i32_0 : i32, i32
  }
  func.func @transform_2(%arg0: i32) -> (i32, i32) {
    %c0_i32 = arith.constant 0 : i32
    %c0_i32_0 = arith.constant 0 : i32
    %c0_i32_1 = arith.constant 0 : i32
    return %c0_i32, %c0_i32_0 : i32, i32
  }
  func.func @transform_3(%arg0: i32) -> (i32, i32) {
    %c0_i32 = arith.constant 0 : i32
    %c0_i32_0 = arith.constant 0 : i32
    return %arg0, %c0_i32 : i32, i32
  }
}

module attributes {stable_mosaic.version = 11 : i64} {
  func.func @matmul_bias_act_kernel(%arg0: i32, %arg1: memref<512x4xf32, #tpu.memory_space<vmem>>, %arg2: memref<4x128xf32, #tpu.memory_space<vmem>>, %arg3: memref<1x128xf32, #tpu.memory_space<vmem>>, %arg4: memref<512x128xf32, #tpu.memory_space<vmem>>) attributes {dimension_semantics = [#tpu.dimension_semantics<parallel>], iteration_bounds = array<i64: 1>, scalar_prefetch = 0 : i64, scratch_operands = 0 : i64, tpu.core_type = #tpu.core_type<tc>, window_params = [{transform_indices = @transform_0, window_bounds = array<i64: 512, 4>}, {pipeline_mode = #tpu.pipeline_mode<synchronous>, transform_indices = @transform_1, window_bounds = array<i64: 4, 128>}, {pipeline_mode = #tpu.pipeline_mode<synchronous>, transform_indices = @transform_2, window_bounds = array<i64: 1, 128>}, {transform_indices = @transform_3, window_bounds = array<i64: 512, 128>}]} {
    %c0 = arith.constant 0 : index
    %c0_0 = arith.constant 0 : index
    %0 = vector.load %arg1[%c0, %c0_0] : memref<512x4xf32, #tpu.memory_space<vmem>>, vector<512x4xf32>
    %c0_1 = arith.constant 0 : index
    %c0_2 = arith.constant 0 : index
    %1 = vector.load %arg2[%c0_1, %c0_2] : memref<4x128xf32, #tpu.memory_space<vmem>>, vector<4x128xf32>
    %cst = arith.constant dense<0.000000e+00> : vector<512x128xf32>
    %2 = tpu.matmul %0, %1, %cst {dimension_numbers = #tpu.dot_dimension_numbers<[1], [0], [0], [1], [0, 0, 1, 1], [], []>} : vector<512x4xf32>, vector<4x128xf32>, vector<512x128xf32> -> vector<512x128xf32>
    %c0_3 = arith.constant 0 : index
    %c0_4 = arith.constant 0 : index
    %3 = vector.load %arg3[%c0_3, %c0_4] : memref<1x128xf32, #tpu.memory_space<vmem>>, vector<1x128xf32>
    %4 = vector.broadcast %3 : vector<1x128xf32> to vector<512x128xf32>
    %5 = arith.addf %2, %4 : vector<512x128xf32>
    %c0_5 = arith.constant 0 : index
    %c0_6 = arith.constant 0 : index
    %6 = vector.load %arg4[%c0_5, %c0_6] : memref<512x128xf32, #tpu.memory_space<vmem>>, vector<512x128xf32>
    tpu.vector_store %arg4[%c0_5, %c0_6], %5 {strides = array<i32>} : memref<512x128xf32, #tpu.memory_space<vmem>>, vector<512x128xf32>,
    return
  }
  func.func @transform_0(%arg0: i32) -> (i32, i32) {
    %c0_i32 = arith.constant 0 : i32
    %c0_i32_0 = arith.constant 0 : i32
    return %arg0, %c0_i32 : i32, i32
  }
  func.func @transform_1(%arg0: i32) -> (i32, i32) {
    %c0_i32 = arith.constant 0 : i32
    %c0_i32_0 = arith.constant 0 : i32
    %c0_i32_1 = arith.constant 0 : i32
    return %c0_i32, %c0_i32_0 : i32, i32
  }
  func.func @transform_2(%arg0: i32) -> (i32, i32) {
    %c0_i32 = arith.constant 0 : i32
    %c0_i32_0 = arith.constant 0 : i32
    %c0_i32_1 = arith.constant 0 : i32
    return %c0_i32, %c0_i32_0 : i32, i32
  }
  func.func @transform_3(%arg0: i32) -> (i32, i32) {
    %c0_i32 = arith.constant 0 : i32
    %c0_i32_0 = arith.constant 0 : i32
    return %arg0, %c0_i32 : i32, i32
  }
}

</mosaic_0001>

<bundles_post_ra>
// kernel: spectral_transform_forward.4
= control target key start
LH: loop header
LB: loop body
LE: loop exit
PB: predicated region body
PF: predicated region fallthrough
CT: control target
= control target key end

     0   :  { %vm279_vm0 = vcmask 1043456   ;;  %vm86_vm1 = vcmask 31744   ;;  %s1571_s1 = inlined_call_operand.vmem [shape: f32[4,128], index: 1, kind: input, shape index: {}]   ;;  %s1572_s0 = inlined_call_operand.vmem [shape: f32[512,4], index: 0, kind: input, shape index: {}]   ;;  %s1573_s2 = inlined_call_operand.vmem [shape: f32[1,128], index: 2, kind: input, shape index: {}]   ;;  %s1574_s3 = inlined_call_operand.vmem [shape: f32[512,128], index: 3, kind: output, shape index: {}]  }
   0x1   :  { %v78_v0 = vld [vmem:[%s1571_s1] sm:$0xf]  ;;  %v15_v3 = vld [vmem:[%s1572_s0 + $0x8] sm:$0xff]  ;;  %v16_v5 = vld [vmem:[%s1572_s0 + $0x10] sm:$0xff] }
   0x2   :  { %v14_v1 = vld [vmem:[%s1572_s0] sm:$0xff]  ;;  %931 = vmatprep.subr.msk.mxu0 %vm279_vm0, %v78_v0  ;;  %1029 = vmatprep.subr.msk.mxu1 %vm279_vm0, %v78_v0  ;;  %v47_v4 = vld [vmem:[%s1572_s0 + $0x108] sm:$0xff]  ;;  %v48_v6 = vld [vmem:[%s1572_s0 + $0x110] sm:$0xff] }
   0x3   :  { %v46_v2 = vld [vmem:[%s1572_s0 + $0x100] sm:$0xff]  ;;  %932 = vmatpush3.msk.msra.mxu0 %vm279_vm0, %v78_v0  ;;  %1030 = vmatpush3.msk.msra.mxu1 %vm279_vm0, %v78_v0  ;;  %v17_v7 = vld [vmem:[%s1572_s0 + $0x18] sm:$0xff]  ;;  %v19_v11 = vld [vmem:[%s1572_s0 + $0x28] sm:$0xff] }
   0x4   :  { %933 = vmatprep.mubr.msk.f32.mxu0 %vm86_vm1, %v14_v1  ;;  %981 = vmatprep.mubr.msk.f32.mxu1 %vm86_vm1, %v46_v2  ;;  %v49_v8 = vld [vmem:[%s1572_s0 + $0x118] sm:$0xff]  ;;  %v18_v9 = vld [vmem:[%s1572_s0 + $0x20] sm:$0xff]  ;;  %v51_v12 = vld [vmem:[%s1572_s0 + $0x128] sm:$0xff] }
   0x5   :  { %934 = vmatmul.mubr.msk.f32.vlgmr.msra.gmra.mrb[0].mxu0 %vm86_vm1, %v15_v3  ;;  %982 = vmatmul.mubr.msk.f32.vlgmr.msra.gmra.mrb[0].mxu1 %vm86_vm1, %v47_v4  ;;  %v50_v10 = vld [vmem:[%s1572_s0 + $0x120] sm:$0xff]  ;;  %v20_v13 = vld [vmem:[%s1572_s0 + $0x30] sm:$0xff]  ;;  %v21_v15 = vld [vmem:[%s1572_s0 + $0x38] sm:$0xff] }
   0x6   :  { %936 = vmatprep.mubr.msk.f32.mxu0 %vm86_vm1, %v16_v5  ;;  %984 = vmatprep.mubr.msk.f32.mxu1 %vm86_vm1, %v48_v6  ;;  %v52_v14 = vld [vmem:[%s1572_s0 + $0x130] sm:$0xff]  ;;  %v53_v16 = vld [vmem:[%s1572_s0 + $0x138] sm:$0xff]  ;;  %v22_v17 = vld [vmem:[%s1572_s0 + $0x40] sm:$0xff] }
   0x7   :  { %v54_v18 = vld [vmem:[%s1572_s0 + $0x140] sm:$0xff]  ;;  %v23_v19 = vld [vmem:[%s1572_s0 + $0x48] sm:$0xff]  ;;  %v24_v21 = vld [vmem:[%s1572_s0 + $0x50] sm:$0xff] }
   0x8   :  { %v55_v20 = vld [vmem:[%s1572_s0 + $0x148] sm:$0xff]  ;;  %v56_v22 = vld [vmem:[%s1572_s0 + $0x150] sm:$0xff]  ;;  %v25_v23 = vld [vmem:[%s1572_s0 + $0x58] sm:$0xff] }
   0x9   :  { %937 = vmatmul.mubr.msk.f32.gmra.mrb[2].mxu0 %vm86_vm1, %v17_v7  ;;  %985 = vmatmul.mubr.msk.f32.gmra.mrb[2].mxu1 %vm86_vm1, %v49_v8  ;;  %v57_v24 = vld [vmem:[%s1572_s0 + $0x158] sm:$0xff]  ;;  %v26_v25 = vld [vmem:[%s1572_s0 + $0x60] sm:$0xff]  ;;  %v27_v27 = vld [vmem:[%s1572_s0 + $0x68] sm:$0xff] }
   0xa   :  { %939 = vmatprep.mubr.msk.f32.mxu0 %vm86_vm1, %v18_v9  ;;  %987 = vmatprep.mubr.msk.f32.mxu1 %vm86_vm1, %v50_v10  ;;  %v58_v26 = vld [vmem:[%s1572_s0 + $0x160] sm:$0xff]  ;;  %v59_v28 = vld [vmem:[%s1572_s0 + $0x168] sm:$0xff]  ;;  %v28_v29 = vld [vmem:[%s1572_s0 + $0x70] sm:$0xff] }
   0xb   :  { %v60_v30 = vld [vmem:[%s1572_s0 + $0x170] sm:$0xff]  ;;  %v29_v31 = vld [vmem:[%s1572_s0 + $0x78] sm:$0xff]  ;;  %v30_v33 = vld [vmem:[%s1572_s0 + $0x80] sm:$0xff] }
   0xc   :  { %v61_v32 = vld [vmem:[%s1572_s0 + $0x178] sm:$0xff]  ;;  %v62_v34 = vld [vmem:[%s1572_s0 + $0x180] sm:$0xff]  ;;  %v31_v35 = vld [vmem:[%s1572_s0 + $0x88] sm:$0xff] }
   0xd   :  { %940 = vmatmul.mubr.msk.f32.gmra.mrb[4].mxu0 %vm86_vm1, %v19_v11  ;;  %988 = vmatmul.mubr.msk.f32.gmra.mrb[4].mxu1 %vm86_vm1, %v51_v12  ;;  %v63_v36 = vld [vmem:[%s1572_s0 + $0x188] sm:$0xff]  ;;  %v32_v37 = vld [vmem:[%s1572_s0 + $0x90] sm:$0xff]  ;;  %v33_v39 = vld [vmem:[%s1572_s0 + $0x98] sm:$0xff] }
   0xe   :  { %942 = vmatprep.mubr.msk.f32.mxu0 %vm86_vm1, %v20_v13  ;;  %990 = vmatprep.mubr.msk.f32.mxu1 %vm86_vm1, %v52_v14  ;;  %v64_v38 = vld [vmem:[%s1572_s0 + $0x190] sm:$0xff]  ;;  %v65_v40 = vld [vmem:[%s1572_s0 + $0x198] sm:$0xff]  ;;  %v34_v41 = vld [vmem:[%s1572_s0 + $0xa0] sm:$0xff] }
   0xf   :  { %v66_v42 = vld [vmem:[%s1572_s0 + $0x1a0] sm:$0xff]  ;;  %v35_v43 = vld [vmem:[%s1572_s0 + $0xa8] sm:$0xff]  ;;  %v36_v45 = vld [vmem:[%s1572_s0 + $0xb0] sm:$0xff] }
  0x10   :  { %v67_v44 = vld [vmem:[%s1572_s0 + $0x1a8] sm:$0xff]  ;;  %v68_v46 = vld [vmem:[%s1572_s0 + $0x1b0] sm:$0xff]  ;;  %v37_v47 = vld [vmem:[%s1572_s0 + $0xb8] sm:$0xff] }
  0x11   :  { %943 = vmatmul.mubr.msk.f32.gmra.mrb[6].mxu0 %vm86_vm1, %v21_v15  ;;  %991 = vmatmul.mubr.msk.f32.gmra.mrb[6].mxu1 %vm86_vm1, %v53_v16  ;;  %v69_v48 = vld [vmem:[%s1572_s0 + $0x1b8] sm:$0xff]  ;;  %v38_v49 = vld [vmem:[%s1572_s0 + $0xc0] sm:$0xff]  ;;  %v39_v51 = vld [vmem:[%s1572_s0 + $0xc8] sm:$0xff] }
  0x12   :  { %945 = vmatprep.mubr.msk.f32.mxu0 %vm86_vm1, %v22_v17  ;;  %993 = vmatprep.mubr.msk.f32.mxu1 %vm86_vm1, %v54_v18  ;;  %v70_v50 = vld [vmem:[%s1572_s0 + $0x1c0] sm:$0xff]  ;;  %v71_v52 = vld [vmem:[%s1572_s0 + $0x1c8] sm:$0xff]  ;;  %v40_v53 = vld [vmem:[%s1572_s0 + $0xd0] sm:$0xff] }
  0x13   :  { %v72_v54 = vld [vmem:[%s1572_s0 + $0x1d0] sm:$0xff]  ;;  %v41_v55 = vld [vmem:[%s1572_s0 + $0xd8] sm:$0xff]  ;;  %v42_v57 = vld [vmem:[%s1572_s0 + $0xe0] sm:$0xff] }
  0x14   :  { %v73_v56 = vld [vmem:[%s1572_s0 + $0x1d8] sm:$0xff]  ;;  %v74_v58 = vld [vmem:[%s1572_s0 + $0x1e0] sm:$0xff]  ;;  %v43_v59 = vld [vmem:[%s1572_s0 + $0xe8] sm:$0xff] }
  0x15   :  { %946 = vmatmul.mubr.msk.f32.gmra.mrb[8].mxu0 %vm86_vm1, %v23_v19  ;;  %994 = vmatmul.mubr.msk.f32.gmra.mrb[8].mxu1 %vm86_vm1, %v55_v20  ;;  %v75_v60 = vld [vmem:[%s1572_s0 + $0x1e8] sm:$0xff]  ;;  %v44_v61 = vld [vmem:[%s1572_s0 + $0xf0] sm:$0xff]  ;;  %v45_v63 = vld [vmem:[%s1572_s0 + $0xf8] sm:$0xff] }
  0x16   :  { %948 = vmatprep.mubr.msk.f32.mxu0 %vm86_vm1, %v24_v21  ;;  %996 = vmatprep.mubr.msk.f32.mxu1 %vm86_vm1, %v56_v22  ;;  %v76_v62 = vld [vmem:[%s1572_s0 + $0x1f0] sm:$0xff]  ;;  %v77_v0 = vld [vmem:[%s1572_s0 + $0x1f8] sm:$0xff]  ;;  %v1313_v1 = vld [vmem:[%s1573_s2] ss:$0 sm:$0xff] }
  0x19   :  { %949 = vmatmul.mubr.msk.f32.gmra.mrb[10].mxu0 %vm86_vm1, %v25_v23  ;;  %997 = vmatmul.mubr.msk.f32.gmra.mrb[10].mxu1 %vm86_vm1, %v57_v24 }
  0x1a   :  { %951 = vmatprep.mubr.msk.f32.mxu0 %vm86_vm1, %v26_v25  ;;  %999 = vmatprep.mubr.msk.f32.mxu1 %vm86_vm1, %v58_v26 }
  0x1d   :  { %952 = vmatmul.mubr.msk.f32.gmra.mrb[12].mxu0 %vm86_vm1, %v27_v27  ;;  %1000 = vmatmul.mubr.msk.f32.gmra.mrb[12].mxu1 %vm86_vm1, %v59_v28 }
  0x1e   :  { %954 = vmatprep.mubr.msk.f32.mxu0 %vm86_vm1, %v28_v29  ;;  %1002 = vmatprep.mubr.msk.f32.mxu1 %vm86_vm1, %v60_v30 }
  0x21   :  { %955 = vmatmul.mubr.msk.f32.gmra.mrb[14].mxu0 %vm86_vm1, %v29_v31  ;;  %1003 = vmatmul.mubr.msk.f32.gmra.mrb[14].mxu1 %vm86_vm1, %v61_v32 }
  0x22   :  { %957 = vmatprep.mubr.msk.f32.mxu0 %vm86_vm1, %v30_v33  ;;  %1005 = vmatprep.mubr.msk.f32.mxu1 %vm86_vm1, %v62_v34 }
  0x25   :  { %958 = vmatmul.mubr.msk.f32.gmra.mrb[16].mxu0 %vm86_vm1, %v31_v35  ;;  %1006 = vmatmul.mubr.msk.f32.gmra.mrb[16].mxu1 %vm86_vm1, %v63_v36 }
  0x26   :  { %960 = vmatprep.mubr.msk.f32.mxu0 %vm86_vm1, %v32_v37  ;;  %1008 = vmatprep.mubr.msk.f32.mxu1 %vm86_vm1, %v64_v38 }
  0x29   :  { %961 = vmatmul.mubr.msk.f32.gmra.mrb[18].mxu0 %vm86_vm1, %v33_v39  ;;  %1009 = vmatmul.mubr.msk.f32.gmra.mrb[18].mxu1 %vm86_vm1, %v65_v40 }
  0x2a   :  { %963 = vmatprep.mubr.msk.f32.mxu0 %vm86_vm1, %v34_v41  ;;  %1011 = vmatprep.mubr.msk.f32.mxu1 %vm86_vm1, %v66_v42 }
  0x2d   :  { %964 = vmatmul.mubr.msk.f32.gmra.mrb[20].mxu0 %vm86_vm1, %v35_v43  ;;  %1012 = vmatmul.mubr.msk.f32.gmra.mrb[20].mxu1 %vm86_vm1, %v67_v44 }
  0x2e   :  { %966 = vmatprep.mubr.msk.f32.mxu0 %vm86_vm1, %v36_v45  ;;  %1014 = vmatprep.mubr.msk.f32.mxu1 %vm86_vm1, %v68_v46 }
  0x31   :  { %967 = vmatmul.mubr.msk.f32.gmra.mrb[22].mxu0 %vm86_vm1, %v37_v47  ;;  %1015 = vmatmul.mubr.msk.f32.gmra.mrb[22].mxu1 %vm86_vm1, %v69_v48 }
  0x32   :  { %969 = vmatprep.mubr.msk.f32.mxu0 %vm86_vm1, %v38_v49  ;;  %1017 = vmatprep.mubr.msk.f32.mxu1 %vm86_vm1, %v70_v50 }
  0x35   :  { %970 = vmatmul.mubr.msk.f32.gmra.mrb[24].mxu0 %vm86_vm1, %v39_v51  ;;  %1018 = vmatmul.mubr.msk.f32.gmra.mrb[24].mxu1 %vm86_vm1, %v71_v52 }
  0x36   :  { %972 = vmatprep.mubr.msk.f32.mxu0 %vm86_vm1, %v40_v53  ;;  %1020 = vmatprep.mubr.msk.f32.mxu1 %vm86_vm1, %v72_v54 }
  0x39   :  { %973 = vmatmul.mubr.msk.f32.gmra.mrb[26].mxu0 %vm86_vm1, %v41_v55  ;;  %1021 = vmatmul.mubr.msk.f32.gmra.mrb[26].mxu1 %vm86_vm1, %v73_v56 }
  0x3a   :  { %975 = vmatprep.mubr.msk.f32.mxu0 %vm86_vm1, %v42_v57  ;;  %1023 = vmatprep.mubr.msk.f32.mxu1 %vm86_vm1, %v74_v58 }
  0x3d   :  { %976 = vmatmul.mubr.msk.f32.gmra.mrb[28].mxu0 %vm86_vm1, %v43_v59  ;;  %1024 = vmatmul.mubr.msk.f32.gmra.mrb[28].mxu1 %vm86_vm1, %v75_v60 }
  0x3e   :  { %978 = vmatprep.mubr.msk.f32.mxu0 %vm86_vm1, %v44_v61  ;;  %1026 = vmatprep.mubr.msk.f32.mxu1 %vm86_vm1, %v76_v62 }
  0x41   :  { %979 = vmatmul.mubr.msk.f32.gmra.mrb[30].mxu0 %vm86_vm1, %v45_v63  ;;  %1027 = vmatmul.mubr.msk.f32.gmra.mrb[30].mxu1 %vm86_vm1, %v77_v0 }
  0xd8   :  { %v935_v2 = vpop.f32.mrb[0].mxu0  ;;  %v983_v3 = vpop.f32.mrb[0].mxu1 }
  0xd9   :  { %v355_v4 = vadd.f32 %v935_v2, %v1313_v1  ;;  %v515_v5 = vadd.f32 %v983_v3, %v1313_v1  ;;  %v349_v6 = vpop.f32.mrb[1].mxu0  ;;  %v509_v7 = vpop.f32.mrb[1].mxu1 }
  0xda   :  { %v350_v8 = vadd.f32 %v1313_v1, %v349_v6  ;;  %v510_v9 = vadd.f32 %v1313_v1, %v509_v7 }
  0xdb   :  { %v669_v10 = vmax.f32 %v355_v4, 0.0  ;;  %v701_v11 = vmax.f32 %v515_v5, 0.0 }
  0xdc   :  { %v668_v12 = vmax.f32 %v350_v8, 0.0  ;;  %v700_v13 = vmax.f32 %v510_v9, 0.0  ;;  %v938_v14 = vpop.f32.mrb[2].mxu0  ;;  %v986_v15 = vpop.f32.mrb[2].mxu1 }
  0xdd   :  { %733 = vst [vmem:[%s1574_s3 + $0x8] sm:$0xff] %v669_v10  ;;  %765 = vst [vmem:[%s1574_s3 + $0x108] sm:$0xff] %v701_v11  ;;  %v365_v16 = vadd.f32 %v938_v14, %v1313_v1  ;;  %v525_v17 = vadd.f32 %v986_v15, %v1313_v1  ;;  %v359_v18 = vpop.f32.mrb[3].mxu0  ;;  %v519_v19 = vpop.f32.mrb[3].mxu1 }
  0xde   :  { %732 = vst [vmem:[%s1574_s3] sm:$0xff] %v668_v12  ;;  %764 = vst [vmem:[%s1574_s3 + $0x100] sm:$0xff] %v700_v13  ;;  %v360_v20 = vadd.f32 %v1313_v1, %v359_v18  ;;  %v520_v21 = vadd.f32 %v1313_v1, %v519_v19 }
  0xdf   :  { %v671_v22 = vmax.f32 %v365_v16, 0.0  ;;  %v703_v23 = vmax.f32 %v525_v17, 0.0 }
  0xe0   :  { %v670_v24 = vmax.f32 %v360_v20, 0.0  ;;  %v702_v25 = vmax.f32 %v520_v21, 0.0  ;;  %v941_v26 = vpop.f32.mrb[4].mxu0  ;;  %v989_v27 = vpop.f32.mrb[4].mxu1 }
  0xe1   :  { %735 = vst [vmem:[%s1574_s3 + $0x18] sm:$0xff] %v671_v22  ;;  %767 = vst [vmem:[%s1574_s3 + $0x118] sm:$0xff] %v703_v23  ;;  %v375_v28 = vadd.f32 %v941_v26, %v1313_v1  ;;  %v535_v29 = vadd.f32 %v989_v27, %v1313_v1  ;;  %v369_v30 = vpop.f32.mrb[5].mxu0  ;;  %v529_v31 = vpop.f32.mrb[5].mxu1 }
  0xe2   :  { %734 = vst [vmem:[%s1574_s3 + $0x10] sm:$0xff] %v670_v24  ;;  %766 = vst [vmem:[%s1574_s3 + $0x110] sm:$0xff] %v702_v25  ;;  %v370_v32 = vadd.f32 %v1313_v1, %v369_v30  ;;  %v530_v33 = vadd.f32 %v1313_v1, %v529_v31 }
  0xe3   :  { %v673_v34 = vmax.f32 %v375_v28, 0.0  ;;  %v705_v35 = vmax.f32 %v535_v29, 0.0 }
  0xe4   :  { %v672_v36 = vmax.f32 %v370_v32, 0.0  ;;  %v704_v37 = vmax.f32 %v530_v33, 0.0  ;;  %v944_v38 = vpop.f32.mrb[6].mxu0  ;;  %v992_v39 = vpop.f32.mrb[6].mxu1 }
  0xe5   :  { %737 = vst [vmem:[%s1574_s3 + $0x28] sm:$0xff] %v673_v34  ;;  %769 = vst [vmem:[%s1574_s3 + $0x128] sm:$0xff] %v705_v35  ;;  %v385_v40 = vadd.f32 %v944_v38, %v1313_v1  ;;  %v545_v41 = vadd.f32 %v992_v39, %v1313_v1  ;;  %v379_v42 = vpop.f32.mrb[7].mxu0  ;;  %v539_v43 = vpop.f32.mrb[7].mxu1 }
  0xe6   :  { %736 = vst [vmem:[%s1574_s3 + $0x20] sm:$0xff] %v672_v36  ;;  %768 = vst [vmem:[%s1574_s3 + $0x120] sm:$0xff] %v704_v37  ;;  %v380_v44 = vadd.f32 %v1313_v1, %v379_v42  ;;  %v540_v45 = vadd.f32 %v1313_v1, %v539_v43 }
  0xe7   :  { %v675_v46 = vmax.f32 %v385_v40, 0.0  ;;  %v707_v47 = vmax.f32 %v545_v41, 0.0 }
  0xe8   :  { %v674_v48 = vmax.f32 %v380_v44, 0.0  ;;  %v706_v49 = vmax.f32 %v540_v45, 0.0  ;;  %v947_v50 = vpop.f32.mrb[8].mxu0  ;;  %v995_v51 = vpop.f32.mrb[8].mxu1 }
  0xe9   :  { %739 = vst [vmem:[%s1574_s3 + $0x38] sm:$0xff] %v675_v46  ;;  %771 = vst [vmem:[%s1574_s3 + $0x138] sm:$0xff] %v707_v47  ;;  %v395_v52 = vadd.f32 %v947_v50, %v1313_v1  ;;  %v555_v53 = vadd.f32 %v995_v51, %v1313_v1  ;;  %v389_v54 = vpop.f32.mrb[9].mxu0  ;;  %v549_v55 = vpop.f32.mrb[9].mxu1 }
  0xea   :  { %738 = vst [vmem:[%s1574_s3 + $0x30] sm:$0xff] %v674_v48  ;;  %770 = vst [vmem:[%s1574_s3 + $0x130] sm:$0xff] %v706_v49  ;;  %v390_v56 = vadd.f32 %v1313_v1, %v389_v54  ;;  %v550_v57 = vadd.f32 %v1313_v1, %v549_v55 }
  0xeb   :  { %v677_v58 = vmax.f32 %v395_v52, 0.0  ;;  %v709_v59 = vmax.f32 %v555_v53, 0.0 }
  0xec   :  { %v676_v60 = vmax.f32 %v390_v56, 0.0  ;;  %v708_v61 = vmax.f32 %v550_v57, 0.0  ;;  %v950_v62 = vpop.f32.mrb[10].mxu0  ;;  %v998_v63 = vpop.f32.mrb[10].mxu1 }
  0xed   :  { %741 = vst [vmem:[%s1574_s3 + $0x48] sm:$0xff] %v677_v58  ;;  %773 = vst [vmem:[%s1574_s3 + $0x148] sm:$0xff] %v709_v59  ;;  %v405_v0 = vadd.f32 %v950_v62, %v1313_v1  ;;  %v565_v2 = vadd.f32 %v998_v63, %v1313_v1  ;;  %v399_v3 = vpop.f32.mrb[11].mxu0  ;;  %v559_v4 = vpop.f32.mrb[11].mxu1 }
  0xee   :  { %740 = vst [vmem:[%s1574_s3 + $0x40] sm:$0xff] %v676_v60  ;;  %772 = vst [vmem:[%s1574_s3 + $0x140] sm:$0xff] %v708_v61  ;;  %v400_v5 = vadd.f32 %v1313_v1, %v399_v3  ;;  %v560_v6 = vadd.f32 %v1313_v1, %v559_v4 }
  0xef   :  { %v679_v7 = vmax.f32 %v405_v0, 0.0  ;;  %v711_v8 = vmax.f32 %v565_v2, 0.0 }
  0xf0   :  { %v678_v9 = vmax.f32 %v400_v5, 0.0  ;;  %v710_v10 = vmax.f32 %v560_v6, 0.0  ;;  %v953_v11 = vpop.f32.mrb[12].mxu0  ;;  %v1001_v12 = vpop.f32.mrb[12].mxu1 }
  0xf1   :  { %743 = vst [vmem:[%s1574_s3 + $0x58] sm:$0xff] %v679_v7  ;;  %775 = vst [vmem:[%s1574_s3 + $0x158] sm:$0xff] %v711_v8  ;;  %v415_v13 = vadd.f32 %v953_v11, %v1313_v1  ;;  %v575_v14 = vadd.f32 %v1001_v12, %v1313_v1  ;;  %v409_v15 = vpop.f32.mrb[13].mxu0  ;;  %v569_v16 = vpop.f32.mrb[13].mxu1 }
  0xf2   :  { %742 = vst [vmem:[%s1574_s3 + $0x50] sm:$0xff] %v678_v9  ;;  %774 = vst [vmem:[%s1574_s3 + $0x150] sm:$0xff] %v710_v10  ;;  %v410_v17 = vadd.f32 %v1313_v1, %v409_v15  ;;  %v570_v18 = vadd.f32 %v1313_v1, %v569_v16 }
  0xf3   :  { %v681_v19 = vmax.f32 %v415_v13, 0.0  ;;  %v713_v20 = vmax.f32 %v575_v14, 0.0 }
  0xf4   :  { %v680_v21 = vmax.f32 %v410_v17, 0.0  ;;  %v712_v22 = vmax.f32 %v570_v18, 0.0  ;;  %v956_v23 = vpop.f32.mrb[14].mxu0  ;;  %v1004_v24 = vpop.f32.mrb[14].mxu1 }
  0xf5   :  { %745 = vst [vmem:[%s1574_s3 + $0x68] sm:$0xff] %v681_v19  ;;  %777 = vst [vmem:[%s1574_s3 + $0x168] sm:$0xff] %v713_v20  ;;  %v425_v25 = vadd.f32 %v956_v23, %v1313_v1  ;;  %v585_v26 = vadd.f32 %v1004_v24, %v1313_v1  ;;  %v419_v27 = vpop.f32.mrb[15].mxu0  ;;  %v579_v28 = vpop.f32.mrb[15].mxu1 }
  0xf6   :  { %744 = vst [vmem:[%s1574_s3 + $0x60] sm:$0xff] %v680_v21  ;;  %776 = vst [vmem:[%s1574_s3 + $0x160] sm:$0xff] %v712_v22  ;;  %v420_v29 = vadd.f32 %v1313_v1, %v419_v27  ;;  %v580_v30 = vadd.f32 %v1313_v1, %v579_v28 }
  0xf7   :  { %v683_v31 = vmax.f32 %v425_v25, 0.0  ;;  %v715_v32 = vmax.f32 %v585_v26, 0.0 }
  0xf8   :  { %v682_v33 = vmax.f32 %v420_v29, 0.0  ;;  %v714_v34 = vmax.f32 %v580_v30, 0.0  ;;  %v959_v35 = vpop.f32.mrb[16].mxu0  ;;  %v1007_v36 = vpop.f32.mrb[16].mxu1 }
  0xf9   :  { %747 = vst [vmem:[%s1574_s3 + $0x78] sm:$0xff] %v683_v31  ;;  %779 = vst [vmem:[%s1574_s3 + $0x178] sm:$0xff] %v715_v32  ;;  %v435_v37 = vadd.f32 %v959_v35, %v1313_v1  ;;  %v595_v38 = vadd.f32 %v1007_v36, %v1313_v1  ;;  %v429_v39 = vpop.f32.mrb[17].mxu0  ;;  %v589_v40 = vpop.f32.mrb[17].mxu1 }
  0xfa   :  { %746 = vst [vmem:[%s1574_s3 + $0x70] sm:$0xff] %v682_v33  ;;  %778 = vst [vmem:[%s1574_s3 + $0x170] sm:$0xff] %v714_v34  ;;  %v430_v41 = vadd.f32 %v1313_v1, %v429_v39  ;;  %v590_v42 = vadd.f32 %v1313_v1, %v589_v40 }
  0xfb   :  { %v685_v43 = vmax.f32 %v435_v37, 0.0  ;;  %v717_v44 = vmax.f32 %v595_v38, 0.0 }
  0xfc   :  { %v684_v45 = vmax.f32 %v430_v41, 0.0  ;;  %v716_v46 = vmax.f32 %v590_v42, 0.0  ;;  %v962_v47 = vpop.f32.mrb[18].mxu0  ;;  %v1010_v48 = vpop.f32.mrb[18].mxu1 }
  0xfd   :  { %749 = vst [vmem:[%s1574_s3 + $0x88] sm:$0xff] %v685_v43  ;;  %781 = vst [vmem:[%s1574_s3 + $0x188] sm:$0xff] %v717_v44  ;;  %v445_v49 = vadd.f32 %v962_v47, %v1313_v1  ;;  %v605_v50 = vadd.f32 %v1010_v48, %v1313_v1  ;;  %v439_v51 = vpop.f32.mrb[19].mxu0  ;;  %v599_v52 = vpop.f32.mrb[19].mxu1 }
  0xfe   :  { %748 = vst [vmem:[%s1574_s3 + $0x80] sm:$0xff] %v684_v45  ;;  %780 = vst [vmem:[%s1574_s3 + $0x180] sm:$0xff] %v716_v46  ;;  %v440_v53 = vadd.f32 %v1313_v1, %v439_v51  ;;  %v600_v54 = vadd.f32 %v1313_v1, %v599_v52 }
  0xff   :  { %v687_v55 = vmax.f32 %v445_v49, 0.0  ;;  %v719_v56 = vmax.f32 %v605_v50, 0.0 }
 0x100   :  { %v686_v57 = vmax.f32 %v440_v53, 0.0  ;;  %v718_v58 = vmax.f32 %v600_v54, 0.0  ;;  %v965_v59 = vpop.f32.mrb[20].mxu0  ;;  %v1013_v60 = vpop.f32.mrb[20].mxu1 }
 0x101   :  { %751 = vst [vmem:[%s1574_s3 + $0x98] sm:$0xff] %v687_v55  ;;  %783 = vst [vmem:[%s1574_s3 + $0x198] sm:$0xff] %v719_v56  ;;  %v455_v61 = vadd.f32 %v965_v59, %v1313_v1  ;;  %v615_v62 = vadd.f32 %v1013_v60, %v1313_v1  ;;  %v449_v63 = vpop.f32.mrb[21].mxu0  ;;  %v609_v0 = vpop.f32.mrb[21].mxu1 }
 0x102   :  { %750 = vst [vmem:[%s1574_s3 + $0x90] sm:$0xff] %v686_v57  ;;  %782 = vst [vmem:[%s1574_s3 + $0x190] sm:$0xff] %v718_v58  ;;  %v450_v2 = vadd.f32 %v1313_v1, %v449_v63  ;;  %v610_v3 = vadd.f32 %v1313_v1, %v609_v0 }
 0x103   :  { %v689_v4 = vmax.f32 %v455_v61, 0.0  ;;  %v721_v5 = vmax.f32 %v615_v62, 0.0 }
 0x104   :  { %v688_v6 = vmax.f32 %v450_v2, 0.0  ;;  %v720_v7 = vmax.f32 %v610_v3, 0.0  ;;  %v968_v8 = vpop.f32.mrb[22].mxu0  ;;  %v1016_v9 = vpop.f32.mrb[22].mxu1 }
 0x105   :  { %753 = vst [vmem:[%s1574_s3 + $0xa8] sm:$0xff] %v689_v4  ;;  %785 = vst [vmem:[%s1574_s3 + $0x1a8] sm:$0xff] %v721_v5  ;;  %v465_v10 = vadd.f32 %v968_v8, %v1313_v1  ;;  %v625_v11 = vadd.f32 %v1016_v9, %v1313_v1  ;;  %v459_v12 = vpop.f32.mrb[23].mxu0  ;;  %v619_v13 = vpop.f32.mrb[23].mxu1 }
 0x106   :  { %752 = vst [vmem:[%s1574_s3 + $0xa0] sm:$0xff] %v688_v6  ;;  %784 = vst [vmem:[%s1574_s3 + $0x1a0] sm:$0xff] %v720_v7  ;;  %v460_v14 = vadd.f32 %v1313_v1, %v459_v12  ;;  %v620_v15 = vadd.f32 %v1313_v1, %v619_v13 }
 0x107   :  { %v691_v16 = vmax.f32 %v465_v10, 0.0  ;;  %v723_v17 = vmax.f32 %v625_v11, 0.0 }
 0x108   :  { %v690_v18 = vmax.f32 %v460_v14, 0.0  ;;  %v722_v19 = vmax.f32 %v620_v15, 0.0  ;;  %v971_v20 = vpop.f32.mrb[24].mxu0  ;;  %v1019_v21 = vpop.f32.mrb[24].mxu1 }
 0x109   :  { %755 = vst [vmem:[%s1574_s3 + $0xb8] sm:$0xff] %v691_v16  ;;  %787 = vst [vmem:[%s1574_s3 + $0x1b8] sm:$0xff] %v723_v17  ;;  %v475_v22 = vadd.f32 %v971_v20, %v1313_v1  ;;  %v635_v23 = vadd.f32 %v1019_v21, %v1313_v1  ;;  %v469_v24 = vpop.f32.mrb[25].mxu0  ;;  %v629_v25 = vpop.f32.mrb[25].mxu1 }
 0x10a   :  { %754 = vst [vmem:[%s1574_s3 + $0xb0] sm:$0xff] %v690_v18  ;;  %786 = vst [vmem:[%s1574_s3 + $0x1b0] sm:$0xff] %v722_v19  ;;  %v470_v26 = vadd.f32 %v1313_v1, %v469_v24  ;;  %v630_v27 = vadd.f32 %v1313_v1, %v629_v25 }
 0x10b   :  { %v693_v28 = vmax.f32 %v475_v22, 0.0  ;;  %v725_v29 = vmax.f32 %v635_v23, 0.0 }
 0x10c   :  { %v692_v30 = vmax.f32 %v470_v26, 0.0  ;;  %v724_v31 = vmax.f32 %v630_v27, 0.0  ;;  %v974_v32 = vpop.f32.mrb[26].mxu0  ;;  %v1022_v33 = vpop.f32.mrb[26].mxu1 }
 0x10d   :  { %757 = vst [vmem:[%s1574_s3 + $0xc8] sm:$0xff] %v693_v28  ;;  %789 = vst [vmem:[%s1574_s3 + $0x1c8] sm:$0xff] %v725_v29  ;;  %v485_v34 = vadd.f32 %v974_v32, %v1313_v1  ;;  %v645_v35 = vadd.f32 %v1022_v33, %v1313_v1  ;;  %v479_v36 = vpop.f32.mrb[27].mxu0  ;;  %v639_v37 = vpop.f32.mrb[27].mxu1 }
 0x10e   :  { %756 = vst [vmem:[%s1574_s3 + $0xc0] sm:$0xff] %v692_v30  ;;  %788 = vst [vmem:[%s1574_s3 + $0x1c0] sm:$0xff] %v724_v31  ;;  %v480_v38 = vadd.f32 %v1313_v1, %v479_v36  ;;  %v640_v39 = vadd.f32 %v1313_v1, %v639_v37 }
 0x10f   :  { %v695_v40 = vmax.f32 %v485_v34, 0.0  ;;  %v727_v41 = vmax.f32 %v645_v35, 0.0 }
 0x110   :  { %v694_v42 = vmax.f32 %v480_v38, 0.0  ;;  %v726_v43 = vmax.f32 %v640_v39, 0.0  ;;  %v977_v44 = vpop.f32.mrb[28].mxu0  ;;  %v1025_v45 = vpop.f32.mrb[28].mxu1 }
 0x111   :  { %759 = vst [vmem:[%s1574_s3 + $0xd8] sm:$0xff] %v695_v40  ;;  %791 = vst [vmem:[%s1574_s3 + $0x1d8] sm:$0xff] %v727_v41  ;;  %v495_v46 = vadd.f32 %v977_v44, %v1313_v1  ;;  %v655_v47 = vadd.f32 %v1025_v45, %v1313_v1  ;;  %v489_v48 = vpop.f32.mrb[29].mxu0  ;;  %v649_v49 = vpop.f32.mrb[29].mxu1 }
 0x112   :  { %758 = vst [vmem:[%s1574_s3 + $0xd0] sm:$0xff] %v694_v42  ;;  %790 = vst [vmem:[%s1574_s3 + $0x1d0] sm:$0xff] %v726_v43  ;;  %v490_v50 = vadd.f32 %v1313_v1, %v489_v48  ;;  %v650_v51 = vadd.f32 %v1313_v1, %v649_v49 }
 0x113   :  { %v697_v52 = vmax.f32 %v495_v46, 0.0  ;;  %v729_v53 = vmax.f32 %v655_v47, 0.0 }
 0x114   :  { %v696_v54 = vmax.f32 %v490_v50, 0.0  ;;  %v728_v55 = vmax.f32 %v650_v51, 0.0  ;;  %v980_v56 = vpop.f32.mrb[30].mxu0  ;;  %v1028_v57 = vpop.f32.mrb[30].mxu1 }
 0x115   :  { %761 = vst [vmem:[%s1574_s3 + $0xe8] sm:$0xff] %v697_v52  ;;  %793 = vst [vmem:[%s1574_s3 + $0x1e8] sm:$0xff] %v729_v53  ;;  %v505_v58 = vadd.f32 %v980_v56, %v1313_v1  ;;  %v665_v59 = vadd.f32 %v1028_v57, %v1313_v1  ;;  %v499_v60 = vpop.f32.mrb[31].mxu0  ;;  %v659_v61 = vpop.f32.mrb[31].mxu1 }
 0x116   :  { %760 = vst [vmem:[%s1574_s3 + $0xe0] sm:$0xff] %v696_v54  ;;  %792 = vst [vmem:[%s1574_s3 + $0x1e0] sm:$0xff] %v728_v55  ;;  %v500_v62 = vadd.f32 %v1313_v1, %v499_v60  ;;  %v660_v63 = vadd.f32 %v1313_v1, %v659_v61 }
 0x117   :  { %v699_v0 = vmax.f32 %v505_v58, 0.0  ;;  %v731_v2 = vmax.f32 %v665_v59, 0.0 }
 0x118   :  { %v698_v3 = vmax.f32 %v500_v62, 0.0  ;;  %v730_v4 = vmax.f32 %v660_v63, 0.0 }
 0x119   :  { %763 = vst [vmem:[%s1574_s3 + $0xf8] sm:$0xff] %v699_v0  ;;  %795 = vst [vmem:[%s1574_s3 + $0x1f8] sm:$0xff] %v731_v2 }
 0x11a   :  { %762 = vst [vmem:[%s1574_s3 + $0xf0] sm:$0xff] %v698_v3  ;;  %794 = vst [vmem:[%s1574_s3 + $0x1f0] sm:$0xff] %v730_v4 }

// kernel: reverse.0
= control target key start
LH: loop header
LB: loop body
LE: loop exit
PB: predicated region body
PF: predicated region fallthrough
CT: control target
= control target key end

     0   :  { %v71_v3 = vlaneseq  ;;  %v64_v9 = vld [vmem:[#allocation0 + $0x7] ss:$-1 sm:$0xff]  ;;  %v78_v12 = vld [vmem:[#allocation0 + $0x17] ss:$-1 sm:$0xff]  ;;  %s329_s0 = inlined_call_operand.vmem [shape: f32[2,4,16,7], index: 0, kind: input, shape index: {}]   ;;  %s330_s1 = inlined_call_operand.vmem [shape: f32[2,4,16,7], index: 1, kind: output, shape index: {}]  }
   0x1   :  { %v44_v0 = vld [vmem:[%s329_s0] sm:$0xff]  ;;  %v46_v1 = vld [vmem:[%s329_s0 + $0x8] sm:$0xff]  ;;  %v48_v2 = vld [vmem:[%s329_s0 + $0x10] sm:$0xff]  ;;  %v65_v10 = vrot.slane %v64_v9, 1  ;;  %v79_v14 = vrot.slane %v78_v12, 1 }
   0x2   :  { %45 = vst [vmem:[#allocation0 + $0x8] sm:$0xff] %v44_v0  ;;  %47 = vst [vmem:[#allocation0 + $0x18] sm:$0xff] %v46_v1  ;;  %v50_v4 = vld [vmem:[%s329_s0 + $0x18] sm:$0xff]  ;;  %v52_v5 = vld [vmem:[%s329_s0 + $0x20] sm:$0xff]  ;;  %v72_v11 = vshrl.u32 %v71_v3, 7 }
   0x3   :  { %49 = vst [vmem:[#allocation0 + $0x28] sm:$0xff] %v48_v2  ;;  %v54_v6 = vld [vmem:[%s329_s0 + $0x28] sm:$0xff]  ;;  %51 = vst [vmem:[#allocation0 + $0x38] sm:$0xff] %v50_v4  ;;  %v56_v7 = vld [vmem:[%s329_s0 + $0x30] sm:$0xff] }
   0x4   :  { %53 = vst [vmem:[#allocation0 + $0x48] sm:$0xff] %v52_v5  ;;  %55 = vst [vmem:[#allocation0 + $0x58] sm:$0xff] %v54_v6  ;;  %v58_v8 = vld [vmem:[%s329_s0 + $0x38] sm:$0xff]  ;;  %v92_v13 = vld [vmem:[#allocation0 + $0x27] ss:$-1 sm:$0xff]  ;;  %vm73_vm0 = vcmp.lt.s32.totalorder %v72_v11, 7 }
   0x5   :  { %57 = vst [vmem:[#allocation0 + $0x68] sm:$0xff] %v56_v7  ;;  %59 = vst [vmem:[#allocation0 + $0x78] sm:$0xff] %v58_v8  ;;  %v93_v15 = vrot.slane %v92_v13, 1  ;;  %v106_v16 = vld [vmem:[#allocation0 + $0x37] ss:$-1 sm:$0xff] }
   0x6   :  { %66 = vst [vmem:[#allocation1] sm:$0xff] %v65_v10  ;;  %v107_v17 = vrot.slane %v106_v16, 1  ;;  %v120_v18 = vld [vmem:[#allocation0 + $0x47] ss:$-1 sm:$0xff]  ;;  %v134_v19 = vld [vmem:[#allocation0 + $0x57] ss:$-1 sm:$0xff] }
   0x7   :  { %80 = vst [vmem:[#allocation1 + $0x8] sm:$0xff] %v79_v14  ;;  %94 = vst [vmem:[#allocation1 + $0x10] sm:$0xff] %v93_v15  ;;  %v121_v20 = vrot.slane %v120_v18, 1  ;;  %v135_v21 = vrot.slane %v134_v19, 1  ;;  %v148_v22 = vld [vmem:[#allocation0 + $0x67] ss:$-1 sm:$0xff] }
   0x8   :  { %v162_v23 = vld [vmem:[#allocation0 + $0x77] ss:$-1 sm:$0xff]  ;;  %108 = vst [vmem:[#allocation1 + $0x18] sm:$0xff] %v107_v17  ;;  %v149_v24 = vrot.slane %v148_v22, 1 }
   0x9   :  { %v163_v25 = vrot.slane %v162_v23, 1  ;;  %v69_v26 = vld [vmem:[#allocation0 + $0xf] ss:$-1 sm:$0xff]  ;;  %v83_v27 = vld [vmem:[#allocation0 + $0x1f] ss:$-1 sm:$0xff]  ;;  %122 = vst [vmem:[#allocation1 + $0x20] sm:$0xff] %v121_v20 }
   0xa   :  { %v97_v28 = vld [vmem:[#allocation0 + $0x2f] ss:$-1 sm:$0xff]  ;;  %136 = vst [vmem:[#allocation1 + $0x28] sm:$0xff] %v135_v21  ;;  %v70_v29 = vrot.slane %v69_v26, 1  ;;  %v84_v30 = vrot.slane %v83_v27, 1  ;;  %150 = vst [vmem:[#allocation1 + $0x30] sm:$0xff] %v149_v24 }
   0xb   :  { %v98_v31 = vrot.slane %v97_v28, 1  ;;  %v111_v32 = vld [vmem:[#allocation0 + $0x3f] ss:$-1 sm:$0xff]  ;;  %164 = vst [vmem:[#allocation1 + $0x38] sm:$0xff] %v163_v25  ;;  %v125_v34 = vld [vmem:[#allocation0 + $0x4f] ss:$-1 sm:$0xff] }
   0xc   :  { %v112_v33 = vrot.slane %v111_v32, 1  ;;  %v139_v35 = vld [vmem:[#allocation0 + $0x5f] ss:$-1 sm:$0xff]  ;;  %74 = vst.msk [vmem:[#allocation1] sm:$0xff] %vm73_vm0, %v70_v29  ;;  %88 = vst.msk [vmem:[#allocation1 + $0x8] sm:$0xff] %vm73_vm0, %v84_v30  ;;  %v126_v36 = vrot.slane %v125_v34, 1 }
   0xd   :  { %102 = vst.msk [vmem:[#allocation1 + $0x10] sm:$0xff] %vm73_vm0, %v98_v31  ;;  %v140_v37 = vrot.slane %v139_v35, 1  ;;  %v153_v38 = vld [vmem:[#allocation0 + $0x6f] ss:$-1 sm:$0xff]  ;;  %v167_v39 = vld [vmem:[#allocation0 + $0x7f] ss:$-1 sm:$0xff] }
   0xe   :  { %116 = vst.msk [vmem:[#allocation1 + $0x18] sm:$0xff] %vm73_vm0, %v112_v33  ;;  %v154_v40 = vrot.slane %v153_v38, 1  ;;  %v168_v41 = vrot.slane %v167_v39, 1  ;;  %130 = vst.msk [vmem:[#allocation1 + $0x20] sm:$0xff] %vm73_vm0, %v126_v36 }
   0xf   :  { %144 = vst.msk [vmem:[#allocation1 + $0x28] sm:$0xff] %vm73_vm0, %v140_v37 }
  0x10   :  { %158 = vst.msk [vmem:[#allocation1 + $0x30] sm:$0xff] %vm73_vm0, %v154_v40  ;;  %172 = vst.msk [vmem:[#allocation1 + $0x38] sm:$0xff] %vm73_vm0, %v168_v41 }
  0x13   :  { %v214_v42 = vld [vmem:[#allocation1] sm:$0xff]  ;;  %v216_v43 = vld [vmem:[#allocation1 + $0x8] sm:$0xff] }
  0x14   :  { %v218_v44 = vld [vmem:[#allocation1 + $0x10] sm:$0xff]  ;;  %215 = vst [vmem:[%s330_s1] sm:$0xff] %v214_v42  ;;  %217 = vst [vmem:[%s330_s1 + $0x8] sm:$0xff] %v216_v43 }
  0x15   :  { %219 = vst [vmem:[%s330_s1 + $0x10] sm:$0xff] %v218_v44  ;;  %v220_v45 = vld [vmem:[#allocation1 + $0x18] sm:$0xff]  ;;  %v222_v46 = vld [vmem:[#allocation1 + $0x20] sm:$0xff] }
  0x16   :  { %221 = vst [vmem:[%s330_s1 + $0x18] sm:$0xff] %v220_v45  ;;  %v224_v47 = vld [vmem:[#allocation1 + $0x28] sm:$0xff]  ;;  %223 = vst [vmem:[%s330_s1 + $0x20] sm:$0xff] %v222_v46 }
  0x17   :  { %225 = vst [vmem:[%s330_s1 + $0x28] sm:$0xff] %v224_v47  ;;  %v226_v48 = vld [vmem:[#allocation1 + $0x30] sm:$0xff]  ;;  %v228_v49 = vld [vmem:[#allocation1 + $0x38] sm:$0xff] }
  0x18   :  { %227 = vst [vmem:[%s330_s1 + $0x30] sm:$0xff] %v226_v48  ;;  %229 = vst [vmem:[%s330_s1 + $0x38] sm:$0xff] %v228_v49 }

// kernel: spectral_transform_forward.5
= control target key start
LH: loop header
LB: loop body
LE: loop exit
PB: predicated region body
PF: predicated region fallthrough
CT: control target
= control target key end

     0   :  { %vm58_vm0 = vcmask 64512   ;;  %s936_s1 = inlined_call_operand.vmem [shape: f32[8,128], index: 1, kind: input, shape index: {}]   ;;  %s937_s0 = inlined_call_operand.vmem [shape: f32[288,8], index: 0, kind: input, shape index: {}]   ;;  %s938_s2 = inlined_call_operand.vmem [shape: f32[1,128], index: 2, kind: input, shape index: {}]   ;;  %s939_s3 = inlined_call_operand.vmem [shape: f32[288,128], index: 3, kind: output, shape index: {}]  }
   0x1   :  { %v50_v0 = vld [vmem:[%s936_s1] sm:$0xff]  ;;  %v32_v2 = vld [vmem:[%s937_s0 + $0x90] sm:$0xff]  ;;  %v15_v3 = vld [vmem:[%s937_s0 + $0x8] sm:$0xff] }
   0x2   :  { %v14_v1 = vld [vmem:[%s937_s0] sm:$0xff]  ;;  %562 = vmatprep.subr.mxu0 %v50_v0  ;;  %618 = vmatprep.subr.mxu1 %v50_v0  ;;  %v33_v4 = vld [vmem:[%s937_s0 + $0x98] sm:$0xff]  ;;  %v16_v5 = vld [vmem:[%s937_s0 + $0x10] sm:$0xff] }
   0x3   :  { %563 = vmatpush3.msra.mxu0 %v50_v0  ;;  %619 = vmatpush3.msra.mxu1 %v50_v0  ;;  %v34_v6 = vld [vmem:[%s937_s0 + $0xa0] sm:$0xff]  ;;  %v17_v7 = vld [vmem:[%s937_s0 + $0x18] sm:$0xff]  ;;  %v35_v8 = vld [vmem:[%s937_s0 + $0xa8] sm:$0xff] }
   0x4   :  { %564 = vmatprep.mubr.msk.f32.mxu0 %vm58_vm0, %v14_v1  ;;  %591 = vmatprep.mubr.msk.f32.mxu1 %vm58_vm0, %v32_v2  ;;  %v18_v9 = vld [vmem:[%s937_s0 + $0x20] sm:$0xff]  ;;  %v36_v10 = vld [vmem:[%s937_s0 + $0xb0] sm:$0xff]  ;;  %v19_v11 = vld [vmem:[%s937_s0 + $0x28] sm:$0xff] }
   0x5   :  { %565 = vmatmul.mubr.msk.f32.vlgmr.msra.gmra.mrb[0].mxu0 %vm58_vm0, %v15_v3  ;;  %592 = vmatmul.mubr.msk.f32.vlgmr.msra.gmra.mrb[0].mxu1 %vm58_vm0, %v33_v4  ;;  %v37_v12 = vld [vmem:[%s937_s0 + $0xb8] sm:$0xff]  ;;  %v20_v13 = vld [vmem:[%s937_s0 + $0x30] sm:$0xff]  ;;  %v38_v14 = vld [vmem:[%s937_s0 + $0xc0] sm:$0xff] }
   0x6   :  { %567 = vmatprep.mubr.msk.f32.mxu0 %vm58_vm0, %v16_v5  ;;  %594 = vmatprep.mubr.msk.f32.mxu1 %vm58_vm0, %v34_v6  ;;  %v21_v15 = vld [vmem:[%s937_s0 + $0x38] sm:$0xff]  ;;  %v39_v16 = vld [vmem:[%s937_s0 + $0xc8] sm:$0xff]  ;;  %v22_v17 = vld [vmem:[%s937_s0 + $0x40] sm:$0xff] }
   0x7   :  { %v40_v18 = vld [vmem:[%s937_s0 + $0xd0] sm:$0xff]  ;;  %v23_v19 = vld [vmem:[%s937_s0 + $0x48] sm:$0xff]  ;;  %v41_v20 = vld [vmem:[%s937_s0 + $0xd8] sm:$0xff] }
   0x8   :  { %v24_v21 = vld [vmem:[%s937_s0 + $0x50] sm:$0xff]  ;;  %v42_v22 = vld [vmem:[%s937_s0 + $0xe0] sm:$0xff]  ;;  %v25_v23 = vld [vmem:[%s937_s0 + $0x58] sm:$0xff] }
   0x9   :  { %568 = vmatmul.mubr.msk.f32.gmra.mrb[2].mxu0 %vm58_vm0, %v17_v7  ;;  %595 = vmatmul.mubr.msk.f32.gmra.mrb[2].mxu1 %vm58_vm0, %v35_v8  ;;  %v43_v24 = vld [vmem:[%s937_s0 + $0xe8] sm:$0xff]  ;;  %v26_v25 = vld [vmem:[%s937_s0 + $0x60] sm:$0xff]  ;;  %v44_v26 = vld [vmem:[%s937_s0 + $0xf0] sm:$0xff] }
   0xa   :  { %570 = vmatprep.mubr.msk.f32.mxu0 %vm58_vm0, %v18_v9  ;;  %597 = vmatprep.mubr.msk.f32.mxu1 %vm58_vm0, %v36_v10  ;;  %v27_v27 = vld [vmem:[%s937_s0 + $0x68] sm:$0xff]  ;;  %v45_v28 = vld [vmem:[%s937_s0 + $0xf8] sm:$0xff]  ;;  %v28_v29 = vld [vmem:[%s937_s0 + $0x70] sm:$0xff] }
   0xb   :  { %v46_v30 = vld [vmem:[%s937_s0 + $0x100] sm:$0xff]  ;;  %v29_v31 = vld [vmem:[%s937_s0 + $0x78] sm:$0xff]  ;;  %v47_v32 = vld [vmem:[%s937_s0 + $0x108] sm:$0xff] }
   0xc   :  { %v30_v33 = vld [vmem:[%s937_s0 + $0x80] sm:$0xff]  ;;  %v48_v34 = vld [vmem:[%s937_s0 + $0x110] sm:$0xff]  ;;  %v31_v35 = vld [vmem:[%s937_s0 + $0x88] sm:$0xff] }
   0xd   :  { %571 = vmatmul.mubr.msk.f32.gmra.mrb[4].mxu0 %vm58_vm0, %v19_v11  ;;  %598 = vmatmul.mubr.msk.f32.gmra.mrb[4].mxu1 %vm58_vm0, %v37_v12  ;;  %v49_v36 = vld [vmem:[%s937_s0 + $0x118] sm:$0xff]  ;;  %v790_v37 = vld [vmem:[%s938_s2] ss:$0 sm:$0xff] }
   0xe   :  { %573 = vmatprep.mubr.msk.f32.mxu0 %vm58_vm0, %v20_v13  ;;  %600 = vmatprep.mubr.msk.f32.mxu1 %vm58_vm0, %v38_v14 }
  0x11   :  { %574 = vmatmul.mubr.msk.f32.gmra.mrb[6].mxu0 %vm58_vm0, %v21_v15  ;;  %601 = vmatmul.mubr.msk.f32.gmra.mrb[6].mxu1 %vm58_vm0, %v39_v16 }
  0x12   :  { %576 = vmatprep.mubr.msk.f32.mxu0 %vm58_vm0, %v22_v17  ;;  %603 = vmatprep.mubr.msk.f32.mxu1 %vm58_vm0, %v40_v18 }
  0x15   :  { %577 = vmatmul.mubr.msk.f32.gmra.mrb[8].mxu0 %vm58_vm0, %v23_v19  ;;  %604 = vmatmul.mubr.msk.f32.gmra.mrb[8].mxu1 %vm58_vm0, %v41_v20 }
  0x16   :  { %579 = vmatprep.mubr.msk.f32.mxu0 %vm58_vm0, %v24_v21  ;;  %606 = vmatprep.mubr.msk.f32.mxu1 %vm58_vm0, %v42_v22 }
  0x19   :  { %580 = vmatmul.mubr.msk.f32.gmra.mrb[10].mxu0 %vm58_vm0, %v25_v23  ;;  %607 = vmatmul.mubr.msk.f32.gmra.mrb[10].mxu1 %vm58_vm0, %v43_v24 }
  0x1a   :  { %582 = vmatprep.mubr.msk.f32.mxu0 %vm58_vm0, %v26_v25  ;;  %609 = vmatprep.mubr.msk.f32.mxu1 %vm58_vm0, %v44_v26 }
  0x1d   :  { %583 = vmatmul.mubr.msk.f32.gmra.mrb[12].mxu0 %vm58_vm0, %v27_v27  ;;  %610 = vmatmul.mubr.msk.f32.gmra.mrb[12].mxu1 %vm58_vm0, %v45_v28 }
  0x1e   :  { %585 = vmatprep.mubr.msk.f32.mxu0 %vm58_vm0, %v28_v29  ;;  %612 = vmatprep.mubr.msk.f32.mxu1 %vm58_vm0, %v46_v30 }
  0x21   :  { %586 = vmatmul.mubr.msk.f32.gmra.mrb[14].mxu0 %vm58_vm0, %v29_v31  ;;  %613 = vmatmul.mubr.msk.f32.gmra.mrb[14].mxu1 %vm58_vm0, %v47_v32 }
  0x22   :  { %588 = vmatprep.mubr.msk.f32.mxu0 %vm58_vm0, %v30_v33  ;;  %615 = vmatprep.mubr.msk.f32.mxu1 %vm58_vm0, %v48_v34 }
  0x25   :  { %589 = vmatmul.mubr.msk.f32.gmra.mrb[16].mxu0 %vm58_vm0, %v31_v35  ;;  %616 = vmatmul.mubr.msk.f32.gmra.mrb[16].mxu1 %vm58_vm0, %v49_v36 }
  0xd8   :  { %v566_v38 = vpop.f32.mrb[0].mxu0  ;;  %v593_v39 = vpop.f32.mrb[0].mxu1 }
  0xd9   :  { %v239_v40 = vadd.f32 %v566_v38, %v790_v37  ;;  %v329_v41 = vadd.f32 %v593_v39, %v790_v37  ;;  %v233_v42 = vpop.f32.mrb[1].mxu0  ;;  %v323_v43 = vpop.f32.mrb[1].mxu1 }
  0xda   :  { %v234_v44 = vadd.f32 %v790_v37, %v233_v42  ;;  %v324_v45 = vadd.f32 %v790_v37, %v323_v43 }
  0xdb   :  { %v413_v46 = vmax.f32 %v239_v40, 0.0  ;;  %v431_v47 = vmax.f32 %v329_v41, 0.0 }
  0xdc   :  { %v412_v48 = vmax.f32 %v234_v44, 0.0  ;;  %v430_v49 = vmax.f32 %v324_v45, 0.0  ;;  %v569_v50 = vpop.f32.mrb[2].mxu0  ;;  %v596_v51 = vpop.f32.mrb[2].mxu1 }
  0xdd   :  { %449 = vst [vmem:[%s939_s3 + $0x8] sm:$0xff] %v413_v46  ;;  %467 = vst [vmem:[%s939_s3 + $0x98] sm:$0xff] %v431_v47  ;;  %v249_v52 = vadd.f32 %v569_v50, %v790_v37  ;;  %v339_v53 = vadd.f32 %v596_v51, %v790_v37  ;;  %v243_v54 = vpop.f32.mrb[3].mxu0  ;;  %v333_v55 = vpop.f32.mrb[3].mxu1 }
  0xde   :  { %448 = vst [vmem:[%s939_s3] sm:$0xff] %v412_v48  ;;  %466 = vst [vmem:[%s939_s3 + $0x90] sm:$0xff] %v430_v49  ;;  %v244_v56 = vadd.f32 %v790_v37, %v243_v54  ;;  %v334_v57 = vadd.f32 %v790_v37, %v333_v55 }
  0xdf   :  { %v415_v58 = vmax.f32 %v249_v52, 0.0  ;;  %v433_v59 = vmax.f32 %v339_v53, 0.0 }
  0xe0   :  { %v414_v60 = vmax.f32 %v244_v56, 0.0  ;;  %v432_v61 = vmax.f32 %v334_v57, 0.0  ;;  %v572_v62 = vpop.f32.mrb[4].mxu0  ;;  %v599_v63 = vpop.f32.mrb[4].mxu1 }
  0xe1   :  { %451 = vst [vmem:[%s939_s3 + $0x18] sm:$0xff] %v415_v58  ;;  %469 = vst [vmem:[%s939_s3 + $0xa8] sm:$0xff] %v433_v59  ;;  %v259_v0 = vadd.f32 %v572_v62, %v790_v37  ;;  %v349_v1 = vadd.f32 %v599_v63, %v790_v37  ;;  %v253_v2 = vpop.f32.mrb[5].mxu0  ;;  %v343_v3 = vpop.f32.mrb[5].mxu1 }
  0xe2   :  { %450 = vst [vmem:[%s939_s3 + $0x10] sm:$0xff] %v414_v60  ;;  %468 = vst [vmem:[%s939_s3 + $0xa0] sm:$0xff] %v432_v61  ;;  %v254_v4 = vadd.f32 %v790_v37, %v253_v2  ;;  %v344_v5 = vadd.f32 %v790_v37, %v343_v3 }
  0xe3   :  { %v417_v6 = vmax.f32 %v259_v0, 0.0  ;;  %v435_v7 = vmax.f32 %v349_v1, 0.0 }
  0xe4   :  { %v416_v8 = vmax.f32 %v254_v4, 0.0  ;;  %v434_v9 = vmax.f32 %v344_v5, 0.0  ;;  %v575_v10 = vpop.f32.mrb[6].mxu0  ;;  %v602_v11 = vpop.f32.mrb[6].mxu1 }
  0xe5   :  { %453 = vst [vmem:[%s939_s3 + $0x28] sm:$0xff] %v417_v6  ;;  %471 = vst [vmem:[%s939_s3 + $0xb8] sm:$0xff] %v435_v7  ;;  %v269_v12 = vadd.f32 %v575_v10, %v790_v37  ;;  %v359_v13 = vadd.f32 %v602_v11, %v790_v37  ;;  %v263_v14 = vpop.f32.mrb[7].mxu0  ;;  %v353_v15 = vpop.f32.mrb[7].mxu1 }
  0xe6   :  { %452 = vst [vmem:[%s939_s3 + $0x20] sm:$0xff] %v416_v8  ;;  %470 = vst [vmem:[%s939_s3 + $0xb0] sm:$0xff] %v434_v9  ;;  %v264_v16 = vadd.f32 %v790_v37, %v263_v14  ;;  %v354_v17 = vadd.f32 %v790_v37, %v353_v15 }
  0xe7   :  { %v419_v18 = vmax.f32 %v269_v12, 0.0  ;;  %v437_v19 = vmax.f32 %v359_v13, 0.0 }
  0xe8   :  { %v418_v20 = vmax.f32 %v264_v16, 0.0  ;;  %v436_v21 = vmax.f32 %v354_v17, 0.0  ;;  %v578_v22 = vpop.f32.mrb[8].mxu0  ;;  %v605_v23 = vpop.f32.mrb[8].mxu1 }
  0xe9   :  { %455 = vst [vmem:[%s939_s3 + $0x38] sm:$0xff] %v419_v18  ;;  %473 = vst [vmem:[%s939_s3 + $0xc8] sm:$0xff] %v437_v19  ;;  %v279_v24 = vadd.f32 %v578_v22, %v790_v37  ;;  %v369_v25 = vadd.f32 %v605_v23, %v790_v37  ;;  %v273_v26 = vpop.f32.mrb[9].mxu0  ;;  %v363_v27 = vpop.f32.mrb[9].mxu1 }
  0xea   :  { %454 = vst [vmem:[%s939_s3 + $0x30] sm:$0xff] %v418_v20  ;;  %472 = vst [vmem:[%s939_s3 + $0xc0] sm:$0xff] %v436_v21  ;;  %v274_v28 = vadd.f32 %v790_v37, %v273_v26  ;;  %v364_v29 = vadd.f32 %v790_v37, %v363_v27 }
  0xeb   :  { %v421_v30 = vmax.f32 %v279_v24, 0.0  ;;  %v439_v31 = vmax.f32 %v369_v25, 0.0 }
  0xec   :  { %v420_v32 = vmax.f32 %v274_v28, 0.0  ;;  %v438_v33 = vmax.f32 %v364_v29, 0.0  ;;  %v581_v34 = vpop.f32.mrb[10].mxu0  ;;  %v608_v35 = vpop.f32.mrb[10].mxu1 }
  0xed   :  { %457 = vst [vmem:[%s939_s3 + $0x48] sm:$0xff] %v421_v30  ;;  %475 = vst [vmem:[%s939_s3 + $0xd8] sm:$0xff] %v439_v31  ;;  %v289_v36 = vadd.f32 %v581_v34, %v790_v37  ;;  %v379_v38 = vadd.f32 %v608_v35, %v790_v37  ;;  %v283_v39 = vpop.f32.mrb[11].mxu0  ;;  %v373_v40 = vpop.f32.mrb[11].mxu1 }
  0xee   :  { %456 = vst [vmem:[%s939_s3 + $0x40] sm:$0xff] %v420_v32  ;;  %474 = vst [vmem:[%s939_s3 + $0xd0] sm:$0xff] %v438_v33  ;;  %v284_v41 = vadd.f32 %v790_v37, %v283_v39  ;;  %v374_v42 = vadd.f32 %v790_v37, %v373_v40 }
  0xef   :  { %v423_v43 = vmax.f32 %v289_v36, 0.0  ;;  %v441_v44 = vmax.f32 %v379_v38, 0.0 }
  0xf0   :  { %v422_v45 = vmax.f32 %v284_v41, 0.0  ;;  %v440_v46 = vmax.f32 %v374_v42, 0.0  ;;  %v584_v47 = vpop.f32.mrb[12].mxu0  ;;  %v611_v48 = vpop.f32.mrb[12].mxu1 }
  0xf1   :  { %459 = vst [vmem:[%s939_s3 + $0x58] sm:$0xff] %v423_v43  ;;  %477 = vst [vmem:[%s939_s3 + $0xe8] sm:$0xff] %v441_v44  ;;  %v299_v49 = vadd.f32 %v584_v47, %v790_v37  ;;  %v389_v50 = vadd.f32 %v611_v48, %v790_v37  ;;  %v293_v51 = vpop.f32.mrb[13].mxu0  ;;  %v383_v52 = vpop.f32.mrb[13].mxu1 }
  0xf2   :  { %458 = vst [vmem:[%s939_s3 + $0x50] sm:$0xff] %v422_v45  ;;  %476 = vst [vmem:[%s939_s3 + $0xe0] sm:$0xff] %v440_v46  ;;  %v294_v53 = vadd.f32 %v790_v37, %v293_v51  ;;  %v384_v54 = vadd.f32 %v790_v37, %v383_v52 }
  0xf3   :  { %v425_v55 = vmax.f32 %v299_v49, 0.0  ;;  %v443_v56 = vmax.f32 %v389_v50, 0.0 }
  0xf4   :  { %v424_v57 = vmax.f32 %v294_v53, 0.0  ;;  %v442_v58 = vmax.f32 %v384_v54, 0.0  ;;  %v587_v59 = vpop.f32.mrb[14].mxu0  ;;  %v614_v60 = vpop.f32.mrb[14].mxu1 }
  0xf5   :  { %461 = vst [vmem:[%s939_s3 + $0x68] sm:$0xff] %v425_v55  ;;  %479 = vst [vmem:[%s939_s3 + $0xf8] sm:$0xff] %v443_v56  ;;  %v309_v61 = vadd.f32 %v587_v59, %v790_v37  ;;  %v399_v62 = vadd.f32 %v614_v60, %v790_v37  ;;  %v303_v63 = vpop.f32.mrb[15].mxu0  ;;  %v393_v0 = vpop.f32.mrb[15].mxu1 }
  0xf6   :  { %460 = vst [vmem:[%s939_s3 + $0x60] sm:$0xff] %v424_v57  ;;  %478 = vst [vmem:[%s939_s3 + $0xf0] sm:$0xff] %v442_v58  ;;  %v304_v1 = vadd.f32 %v790_v37, %v303_v63  ;;  %v394_v2 = vadd.f32 %v790_v37, %v393_v0 }
  0xf7   :  { %v427_v3 = vmax.f32 %v309_v61, 0.0  ;;  %v445_v4 = vmax.f32 %v399_v62, 0.0 }
  0xf8   :  { %v426_v5 = vmax.f32 %v304_v1, 0.0  ;;  %v444_v6 = vmax.f32 %v394_v2, 0.0  ;;  %v590_v7 = vpop.f32.mrb[16].mxu0  ;;  %v617_v8 = vpop.f32.mrb[16].mxu1 }
  0xf9   :  { %463 = vst [vmem:[%s939_s3 + $0x78] sm:$0xff] %v427_v3  ;;  %481 = vst [vmem:[%s939_s3 + $0x108] sm:$0xff] %v445_v4  ;;  %v319_v9 = vadd.f32 %v590_v7, %v790_v37  ;;  %v409_v10 = vadd.f32 %v617_v8, %v790_v37  ;;  %v313_v11 = vpop.f32.mrb[17].mxu0  ;;  %v403_v12 = vpop.f32.mrb[17].mxu1 }
  0xfa   :  { %462 = vst [vmem:[%s939_s3 + $0x70] sm:$0xff] %v426_v5  ;;  %480 = vst [vmem:[%s939_s3 + $0x100] sm:$0xff] %v444_v6  ;;  %v314_v13 = vadd.f32 %v790_v37, %v313_v11  ;;  %v404_v14 = vadd.f32 %v790_v37, %v403_v12 }
  0xfb   :  { %v429_v15 = vmax.f32 %v319_v9, 0.0  ;;  %v447_v16 = vmax.f32 %v409_v10, 0.0 }
  0xfc   :  { %v428_v17 = vmax.f32 %v314_v13, 0.0  ;;  %v446_v18 = vmax.f32 %v404_v14, 0.0 }
  0xfd   :  { %465 = vst [vmem:[%s939_s3 + $0x88] sm:$0xff] %v429_v15  ;;  %483 = vst [vmem:[%s939_s3 + $0x118] sm:$0xff] %v447_v16 }
  0xfe   :  { %464 = vst [vmem:[%s939_s3 + $0x80] sm:$0xff] %v428_v17  ;;  %482 = vst [vmem:[%s939_s3 + $0x110] sm:$0xff] %v446_v18 }

// kernel: reverse.1
= control target key start
LH: loop header
LB: loop body
LE: loop exit
PB: predicated region body
PF: predicated region fallthrough
CT: control target
= control target key end

     0   :  { %v79_v8 = vld [vmem:[#allocation1 + $0x38] sm:$0xf]  ;;  %v89_v9 = vld [vmem:[#allocation1 + $0x30] sm:$0xf]  ;;  %v99_v10 = vld [vmem:[#allocation1 + $0x28] sm:$0xf]  ;;  %v156_v12 = vlaneseq  ;;  %s487_s0 = inlined_call_operand.vmem [shape: f32[2,4,8,3], index: 0, kind: input, shape index: {}]   ;;  %s488_s1 = inlined_call_operand.vmem [shape: f32[2,4,8,3], index: 1, kind: output, shape index: {}]  }
   0x1   :  { %v18_v0 = vld [vmem:[%s487_s0] sm:$0xf]  ;;  %v20_v1 = vld [vmem:[%s487_s0 + $0x4] sm:$0xf]  ;;  %v22_v2 = vld [vmem:[%s487_s0 + $0x8] sm:$0xf] }
   0x2   :  { %19 = vst [vmem:[#allocation1 + $0x4] sm:$0xf] %v18_v0  ;;  %21 = vst [vmem:[#allocation1 + $0xc] sm:$0xf] %v20_v1  ;;  %v24_v3 = vld [vmem:[%s487_s0 + $0xc] sm:$0xf] }
   0x3   :  { %23 = vst [vmem:[#allocation1 + $0x14] sm:$0xf] %v22_v2  ;;  %v26_v4 = vld [vmem:[%s487_s0 + $0x10] sm:$0xf]  ;;  %v28_v5 = vld [vmem:[%s487_s0 + $0x14] sm:$0xf] }
   0x4   :  { %25 = vst [vmem:[#allocation1 + $0x1c] sm:$0xf] %v24_v3  ;;  %27 = vst [vmem:[#allocation1 + $0x24] sm:$0xf] %v26_v4  ;;  %v30_v6 = vld [vmem:[%s487_s0 + $0x18] sm:$0xf] }
   0x5   :  { %29 = vst [vmem:[#allocation1 + $0x2c] sm:$0xf] %v28_v5  ;;  %v32_v7 = vld [vmem:[%s487_s0 + $0x1c] sm:$0xf]  ;;  %31 = vst [vmem:[#allocation1 + $0x34] sm:$0xf] %v30_v6 }
   0x6   :  { %33 = vst [vmem:[#allocation1 + $0x3c] sm:$0xf] %v32_v7  ;;  %81 = vst [vmem:[#allocation0 + $0x70] sm:$0xf] %v79_v8  ;;  %v109_v11 = vld [vmem:[#allocation1 + $0x20] sm:$0xf] }
   0x7   :  { %91 = vst [vmem:[#allocation0 + $0x60] sm:$0xf] %v89_v9  ;;  %101 = vst [vmem:[#allocation0 + $0x50] sm:$0xf] %v99_v10  ;;  %v119_v13 = vld [vmem:[#allocation1 + $0x18] sm:$0xf] }
   0x8   :  { %111 = vst [vmem:[#allocation0 + $0x40] sm:$0xf] %v109_v11  ;;  %v129_v14 = vld [vmem:[#allocation1 + $0x10] sm:$0xf]  ;;  %v139_v15 = vld [vmem:[#allocation1 + $0x8] sm:$0xf] }
   0x9   :  { %121 = vst [vmem:[#allocation0 + $0x30] sm:$0xf] %v119_v13  ;;  %131 = vst [vmem:[#allocation0 + $0x20] sm:$0xf] %v129_v14  ;;  %v146_v16 = vld [vmem:[#allocation1] sm:$0xf] }
   0xa   :  { %141 = vst [vmem:[#allocation0 + $0x10] sm:$0xf] %v139_v15  ;;  %147 = vst [vmem:[#allocation0] sm:$0xf] %v146_v16  ;;  %v456_v17 = vshrl.u32 %v156_v12, 7 }
   0xb   :  { %v124_v18 = vld [vmem:[#allocation1 + $0x14] sm:$0xf]  ;;  %v134_v19 = vld [vmem:[#allocation1 + $0xc] sm:$0xf]  ;;  %v143_v20 = vld [vmem:[#allocation1 + $0x4] sm:$0xf] }
   0xc   :  { %v94_v21 = vld [vmem:[#allocation1 + $0x2c] sm:$0xf]  ;;  %v104_v22 = vld [vmem:[#allocation1 + $0x24] sm:$0xf]  ;;  %v114_v23 = vld [vmem:[#allocation1 + $0x1c] sm:$0xf] }
   0xd   :  { %126 = vst [vmem:[#allocation0 + $0x28] sm:$0xf] %v124_v18  ;;  %136 = vst [vmem:[#allocation0 + $0x18] sm:$0xf] %v134_v19  ;;  %v74_v24 = vld [vmem:[#allocation1 + $0x3c] sm:$0xf] }
   0xe   :  { %145 = vst [vmem:[#allocation0 + $0x8] sm:$0xf] %v143_v20  ;;  %v84_v25 = vld [vmem:[#allocation1 + $0x34] sm:$0xf]  ;;  %96 = vst [vmem:[#allocation0 + $0x58] sm:$0xf] %v94_v21 }
   0xf   :  { %106 = vst [vmem:[#allocation0 + $0x48] sm:$0xf] %v104_v22  ;;  %116 = vst [vmem:[#allocation0 + $0x38] sm:$0xf] %v114_v23  ;;  %v247_v26 = vld [vmem:[#allocation0 + $0x77] ss:$-1 sm:$0xff] }
  0x10   :  { %76 = vst [vmem:[#allocation0 + $0x78] sm:$0xf] %v74_v24  ;;  %86 = vst [vmem:[#allocation0 + $0x68] sm:$0xf] %v84_v25  ;;  %v205_v27 = vld [vmem:[#allocation0 + $0x47] ss:$-1 sm:$0xff] }
  0x11   :  { %v219_v28 = vld [vmem:[#allocation0 + $0x57] ss:$-1 sm:$0xff]  ;;  %v233_v29 = vld [vmem:[#allocation0 + $0x67] ss:$-1 sm:$0xff]  ;;  %v206_v37 = vrot.slane %v205_v27, 5  ;;  %v248_v41 = vrot.slane %v247_v26, 5 }
  0x12   :  { %v163_v30 = vld [vmem:[#allocation0 + $0x17] ss:$-1 sm:$0xff]  ;;  %v177_v31 = vld [vmem:[#allocation0 + $0x27] ss:$-1 sm:$0xff]  ;;  %v220_v39 = vrot.slane %v219_v28, 5  ;;  %v234_v40 = vrot.slane %v233_v29, 5 }
  0x13   :  { %v191_v32 = vld [vmem:[#allocation0 + $0x37] ss:$-1 sm:$0xff]  ;;  %v149_v33 = vld [vmem:[#allocation0 + $0x7] ss:$-1 sm:$0xff]  ;;  %v164_v34 = vrot.slane %v163_v30, 5  ;;  %v178_v35 = vrot.slane %v177_v31, 5 }
  0x14   :  { %v192_v36 = vrot.slane %v191_v32, 5  ;;  %v150_v38 = vrot.slane %v149_v33, 5  ;;  %vm158_vm0 = vcmp.lt.s32.totalorder %v456_v17, 3  ;;  %207 = vst [vmem:[#allocation2 + $0x20] sm:$0xff] %v206_v37  ;;  %v168_v43 = vld [vmem:[#allocation0 + $0x1f] ss:$-1 sm:$0xff] }
  0x15   :  { %165 = vst [vmem:[#allocation2 + $0x8] sm:$0xff] %v164_v34  ;;  %179 = vst [vmem:[#allocation2 + $0x10] sm:$0xff] %v178_v35  ;;  %v154_v42 = vld [vmem:[#allocation0 + $0xf] ss:$-1 sm:$0xff]  ;;  %v169_v46 = vrot.slane %v168_v43, 5 }
  0x16   :  { %193 = vst [vmem:[#allocation2 + $0x18] sm:$0xff] %v192_v36  ;;  %151 = vst [vmem:[#allocation2] sm:$0xff] %v150_v38  ;;  %v182_v44 = vld [vmem:[#allocation0 + $0x2f] ss:$-1 sm:$0xff]  ;;  %v155_v45 = vrot.slane %v154_v42, 5 }
  0x17   :  { %221 = vst [vmem:[#allocation2 + $0x28] sm:$0xff] %v220_v39  ;;  %235 = vst [vmem:[#allocation2 + $0x30] sm:$0xff] %v234_v40  ;;  %v183_v47 = vrot.slane %v182_v44, 5  ;;  %v196_v48 = vld [vmem:[#allocation0 + $0x3f] ss:$-1 sm:$0xff] }
  0x18   :  { %249 = vst [vmem:[#allocation2 + $0x38] sm:$0xff] %v248_v41  ;;  %v197_v49 = vrot.slane %v196_v48, 5  ;;  %v210_v50 = vld [vmem:[#allocation0 + $0x4f] ss:$-1 sm:$0xff]  ;;  %v224_v51 = vld [vmem:[#allocation0 + $0x5f] ss:$-1 sm:$0xff] }
  0x19   :  { %159 = vst.msk [vmem:[#allocation2] sm:$0xff] %vm158_vm0, %v155_v45  ;;  %173 = vst.msk [vmem:[#allocation2 + $0x8] sm:$0xff] %vm158_vm0, %v169_v46  ;;  %v211_v52 = vrot.slane %v210_v50, 5  ;;  %v225_v53 = vrot.slane %v224_v51, 5  ;;  %v238_v54 = vld [vmem:[#allocation0 + $0x6f] ss:$-1 sm:$0xff] }
  0x1a   :  { %187 = vst.msk [vmem:[#allocation2 + $0x10] sm:$0xff] %vm158_vm0, %v183_v47  ;;  %v252_v55 = vld [vmem:[#allocation0 + $0x7f] ss:$-1 sm:$0xff]  ;;  %201 = vst.msk [vmem:[#allocation2 + $0x18] sm:$0xff] %vm158_vm0, %v197_v49  ;;  %v239_v56 = vrot.slane %v238_v54, 5 }
  0x1b   :  { %v253_v57 = vrot.slane %v252_v55, 5  ;;  %215 = vst.msk [vmem:[#allocation2 + $0x20] sm:$0xff] %vm158_vm0, %v211_v52  ;;  %229 = vst.msk [vmem:[#allocation2 + $0x28] sm:$0xff] %vm158_vm0, %v225_v53 }
  0x1c   :  { %243 = vst.msk [vmem:[#allocation2 + $0x30] sm:$0xff] %vm158_vm0, %v239_v56 }
  0x1d   :  { %257 = vst.msk [vmem:[#allocation2 + $0x38] sm:$0xff] %vm158_vm0, %v253_v57 }
  0x20   :  { %v261_v58 = vld [vmem:[#allocation2] sm:$0xf]  ;;  %v265_v59 = vld [vmem:[#allocation2 + $0x8] sm:$0xf] }
  0x21   :  { %v270_v60 = vld [vmem:[#allocation2 + $0x10] sm:$0xf]  ;;  %263 = vst [vmem:[#allocation3] sm:$0xf] %v261_v58  ;;  %268 = vst [vmem:[#allocation3 + $0x4] sm:$0xf] %v265_v59 }
  0x22   :  { %274 = vst [vmem:[#allocation3 + $0x8] sm:$0xf] %v270_v60  ;;  %v276_v61 = vld [vmem:[#allocation2 + $0x18] sm:$0xf]  ;;  %v282_v62 = vld [vmem:[#allocation2 + $0x20] sm:$0xf] }
  0x23   :  { %280 = vst [vmem:[#allocation3 + $0xc] sm:$0xf] %v276_v61  ;;  %v288_v63 = vld [vmem:[#allocation2 + $0x28] sm:$0xf]  ;;  %286 = vst [vmem:[#allocation3 + $0x10] sm:$0xf] %v282_v62 }
  0x24   :  { %292 = vst [vmem:[#allocation3 + $0x14] sm:$0xf] %v288_v63  ;;  %v294_v0 = vld [vmem:[#allocation2 + $0x30] sm:$0xf]  ;;  %v300_v1 = vld [vmem:[#allocation2 + $0x38] sm:$0xf] }
  0x25   :  { %298 = vst [vmem:[#allocation3 + $0x18] sm:$0xf] %v294_v0  ;;  %304 = vst [vmem:[#allocation3 + $0x1c] sm:$0xf] %v300_v1 }
  0x28   :  { %v320_v2 = vld [vmem:[#allocation3] sm:$0xff]  }
  0x29   :  { %321 = vst [vmem:[%s488_s1] sm:$0xff] %v320_v2  }
  0x2a   :  { %v324_v3 = vld [vmem:[#allocation3 + $0x8] sm:$0xff]  }
  0x2b   :  { %325 = vst [vmem:[%s488_s1 + $0x8] sm:$0xff] %v324_v3   ;;  %v328_v4 = vld [vmem:[#allocation3 + $0x10] sm:$0xff]  }
  0x2c   :  { %329 = vst [vmem:[%s488_s1 + $0x10] sm:$0xff] %v328_v4   ;;  %v332_v5 = vld [vmem:[#allocation3 + $0x18] sm:$0xff]  }
  0x2d   :  { %333 = vst [vmem:[%s488_s1 + $0x18] sm:$0xff] %v332_v5  }

// kernel: spectral_transform_forward.6
= control target key start
LH: loop header
LB: loop body
LE: loop exit
PB: predicated region body
PF: predicated region fallthrough
CT: control target
= control target key end

     0   :  { %vm32_vm0 = vcmask 64512   ;;  %s339_s1 = inlined_call_operand.vmem [shape: f32[8,128], index: 1, kind: input, shape index: {}]   ;;  %s340_s0 = inlined_call_operand.vmem [shape: f32[80,8], index: 0, kind: input, shape index: {}]   ;;  %s341_s2 = inlined_call_operand.vmem [shape: f32[1,128], index: 2, kind: input, shape index: {}]   ;;  %s342_s3 = inlined_call_operand.vmem [shape: f32[80,128], index: 3, kind: output, shape index: {}]  }
   0x1   :  { %v24_v0 = vld [vmem:[%s339_s1] sm:$0xff]  ;;  %v15_v2 = vld [vmem:[%s340_s0 + $0x8] sm:$0xff]  ;;  %v20_v3 = vld [vmem:[%s340_s0 + $0x30] sm:$0xff] }
   0x2   :  { %v14_v1 = vld [vmem:[%s340_s0] sm:$0xff]  ;;  %224 = vmatprep.subr.mxu0 %v24_v0  ;;  %v16_v4 = vld [vmem:[%s340_s0 + $0x10] sm:$0xff]  ;;  %241 = vmatprep.subr.mxu1 %v24_v0  ;;  %v21_v5 = vld [vmem:[%s340_s0 + $0x38] sm:$0xff] }
   0x3   :  { %226 = vmatprep.mubr.msk.f32.mxu0 %vm32_vm0, %v14_v1  ;;  %225 = vmatpush3.msra.mxu0 %v24_v0  ;;  %v22_v6 = vld [vmem:[%s340_s0 + $0x40] sm:$0xff]  ;;  %v17_v7 = vld [vmem:[%s340_s0 + $0x18] sm:$0xff]  ;;  %v23_v9 = vld [vmem:[%s340_s0 + $0x48] sm:$0xff] }
   0x4   :  { %227 = vmatmul.mubr.msk.f32.vlgmr.msra.gmra.mrb[0].mxu0 %vm32_vm0, %v15_v2  ;;  %242 = vmatpush3.msra.mxu1 %v24_v0  ;;  %v18_v8 = vld [vmem:[%s340_s0 + $0x20] sm:$0xff]  ;;  %v19_v10 = vld [vmem:[%s340_s0 + $0x28] sm:$0xff] }
   0x5   :  { %235 = vmatprep.mubr.msk.f32.mxu1 %vm32_vm0, %v20_v3  ;;  %229 = vmatprep.mubr.msk.f32.mxu0 %vm32_vm0, %v16_v4  ;;  %v202_v11 = vld [vmem:[%s341_s2] ss:$0 sm:$0xff] }
   0x6   :  { %236 = vmatmul.mubr.msk.f32.vlgmr.msra.gmra.mrb[0].mxu1 %vm32_vm0, %v21_v5 }
   0x7   :  { %238 = vmatprep.mubr.msk.f32.mxu1 %vm32_vm0, %v22_v6 }
   0x8   :  { %230 = vmatmul.mubr.msk.f32.gmra.mrb[2].mxu0 %vm32_vm0, %v17_v7 }
   0x9   :  { %232 = vmatprep.mubr.msk.f32.mxu0 %vm32_vm0, %v18_v8 }
   0xa   :  { %239 = vmatmul.mubr.msk.f32.gmra.mrb[2].mxu1 %vm32_vm0, %v23_v9 }
   0xc   :  { %233 = vmatmul.mubr.msk.f32.gmra.mrb[4].mxu0 %vm32_vm0, %v19_v10 }
  0xd7   :  { %v228_v12 = vpop.f32.mrb[0].mxu0 }
  0xd8   :  { %v135_v13 = vadd.f32 %v228_v12, %v202_v11  ;;  %v129_v14 = vpop.f32.mrb[1].mxu0 }
  0xd9   :  { %v130_v15 = vadd.f32 %v202_v11, %v129_v14  ;;  %v237_v16 = vpop.f32.mrb[0].mxu1 }
  0xda   :  { %v179_v17 = vmax.f32 %v135_v13, 0.0  ;;  %v165_v18 = vadd.f32 %v237_v16, %v202_v11  ;;  %v159_v19 = vpop.f32.mrb[1].mxu1 }
  0xdb   :  { %v178_v20 = vmax.f32 %v130_v15, 0.0  ;;  %v231_v21 = vpop.f32.mrb[2].mxu0  ;;  %v160_v22 = vadd.f32 %v202_v11, %v159_v19 }
  0xdc   :  { %189 = vst [vmem:[%s342_s3 + $0x8] sm:$0xff] %v179_v17  ;;  %v185_v23 = vmax.f32 %v165_v18, 0.0  ;;  %v145_v24 = vadd.f32 %v231_v21, %v202_v11  ;;  %v139_v25 = vpop.f32.mrb[3].mxu0 }
  0xdd   :  { %188 = vst [vmem:[%s342_s3] sm:$0xff] %v178_v20  ;;  %v184_v26 = vmax.f32 %v160_v22, 0.0  ;;  %v140_v27 = vadd.f32 %v202_v11, %v139_v25  ;;  %v240_v28 = vpop.f32.mrb[2].mxu1 }
  0xde   :  { %195 = vst [vmem:[%s342_s3 + $0x38] sm:$0xff] %v185_v23  ;;  %v181_v29 = vmax.f32 %v145_v24, 0.0  ;;  %v175_v30 = vadd.f32 %v240_v28, %v202_v11  ;;  %v169_v31 = vpop.f32.mrb[3].mxu1 }
  0xdf   :  { %194 = vst [vmem:[%s342_s3 + $0x30] sm:$0xff] %v184_v26  ;;  %v180_v32 = vmax.f32 %v140_v27, 0.0  ;;  %v234_v33 = vpop.f32.mrb[4].mxu0  ;;  %v170_v34 = vadd.f32 %v202_v11, %v169_v31 }
  0xe0   :  { %191 = vst [vmem:[%s342_s3 + $0x18] sm:$0xff] %v181_v29  ;;  %v187_v35 = vmax.f32 %v175_v30, 0.0  ;;  %v155_v36 = vadd.f32 %v234_v33, %v202_v11  ;;  %v149_v37 = vpop.f32.mrb[5].mxu0 }
  0xe1   :  { %190 = vst [vmem:[%s342_s3 + $0x10] sm:$0xff] %v180_v32  ;;  %v186_v38 = vmax.f32 %v170_v34, 0.0  ;;  %v150_v39 = vadd.f32 %v202_v11, %v149_v37 }
  0xe2   :  { %197 = vst [vmem:[%s342_s3 + $0x48] sm:$0xff] %v187_v35  ;;  %v183_v40 = vmax.f32 %v155_v36, 0.0 }
  0xe3   :  { %196 = vst [vmem:[%s342_s3 + $0x40] sm:$0xff] %v186_v38  ;;  %v182_v41 = vmax.f32 %v150_v39, 0.0 }
  0xe4   :  { %193 = vst [vmem:[%s342_s3 + $0x28] sm:$0xff] %v183_v40 }
  0xe5   :  { %192 = vst [vmem:[%s342_s3 + $0x20] sm:$0xff] %v182_v41 }

// kernel: tile.9
= control target key start
LH: loop header
LB: loop body
LE: loop exit
PB: predicated region body
PF: predicated region fallthrough
CT: control target
= control target key end

     0   :  { %vm642_vm0 = vcmask 1047556   ;;  %s1240_s10 = smov 8   ;;  %vm644_vm1 = vcmask 64512   ;;  %vm789_vm2 = vcmask 130112   ;;  %s1811_s0 = inlined_call_operand.vmem [shape: f32[2,2,8,2,8,4], index: 0, kind: input, shape index: {}]   ;;  %s1812_s1 = inlined_call_operand.vmem [shape: f32[2,16,16,4], index: 1, kind: output, shape index: {}]  }
   0x1   :  { %v1202_v0 = vld [vmem:[%s1811_s0 + $0xe] sm:$0x3]  ;;  %v1203_v1 = vld [vmem:[%s1811_s0 + $0xc] sm:$0x3]  ;;  %v1204_v2 = vld [vmem:[%s1811_s0 + $0xa] sm:$0x3] }
   0x2   :  { %608 = vst [vmem:[#allocation0 + $0x38] sm:$0x3] %v1202_v0  ;;  %613 = vst [vmem:[#allocation0 + $0x30] sm:$0x3] %v1203_v1  ;;  %v1205_v3 = vld [vmem:[%s1811_s0 + $0x8] sm:$0x3] }
   0x3   :  { %618 = vst [vmem:[#allocation0 + $0x28] sm:$0x3] %v1204_v2  ;;  %v1206_v4 = vld [vmem:[%s1811_s0 + $0x6] sm:$0x3]  ;;  %v1207_v5 = vld [vmem:[%s1811_s0 + $0x4] sm:$0x3] }
   0x4   :  { %623 = vst [vmem:[#allocation0 + $0x20] sm:$0x3] %v1205_v3  ;;  %628 = vst [vmem:[#allocation0 + $0x18] sm:$0x3] %v1206_v4  ;;  %v1208_v6 = vld [vmem:[%s1811_s0 + $0x2] sm:$0x3] }
   0x5   :  { %633 = vst [vmem:[#allocation0 + $0x10] sm:$0x3] %v1207_v5  ;;  %v638_v7 = vld [vmem:[%s1811_s0] sm:$0x3]  ;;  %637 = vst [vmem:[#allocation0 + $0x8] sm:$0x3] %v1208_v6 }
   0x6   :  { %639 = vst [vmem:[#allocation0] sm:$0x3] %v638_v7  ;;  %v1138_v8 = vld [vmem:[%s1811_s0 + $0x8e] sm:$0x3]  ;;  %v1139_v9 = vld [vmem:[%s1811_s0 + $0x8c] sm:$0x3] }
   0x7   :  { %v1140_v10 = vld [vmem:[%s1811_s0 + $0x8a] sm:$0x3]  ;;  %288 = vst [vmem:[#allocation0 + $0x238] sm:$0x3] %v1138_v8  ;;  %293 = vst [vmem:[#allocation0 + $0x230] sm:$0x3] %v1139_v9 }
   0x8   :  { %298 = vst [vmem:[#allocation0 + $0x228] sm:$0x3] %v1140_v10  ;;  %v1141_v11 = vld [vmem:[%s1811_s0 + $0x88] sm:$0x3]  ;;  %v1142_v12 = vld [vmem:[%s1811_s0 + $0x86] sm:$0x3] }
   0x9   :  { %v1143_v13 = vld [vmem:[%s1811_s0 + $0x84] sm:$0x3]  ;;  %303 = vst [vmem:[#allocation0 + $0x220] sm:$0x3] %v1141_v11  ;;  %308 = vst [vmem:[#allocation0 + $0x218] sm:$0x3] %v1142_v12 }
   0xa   :  { %313 = vst [vmem:[#allocation0 + $0x210] sm:$0x3] %v1143_v13  ;;  %v1144_v14 = vld [vmem:[%s1811_s0 + $0x82] sm:$0x3]  ;;  %v1145_v15 = vld [vmem:[%s1811_s0 + $0x80] sm:$0x3] }
   0xb   :  { %v1170_v16 = vld [vmem:[%s1811_s0 + $0x4e] sm:$0x3]  ;;  %318 = vst [vmem:[#allocation0 + $0x208] sm:$0x3] %v1144_v14  ;;  %323 = vst [vmem:[#allocation0 + $0x200] sm:$0x3] %v1145_v15 }
   0xc   :  { %448 = vst [vmem:[#allocation0 + $0x138] sm:$0x3] %v1170_v16  ;;  %v1171_v17 = vld [vmem:[%s1811_s0 + $0x4c] sm:$0x3]  ;;  %v1172_v18 = vld [vmem:[%s1811_s0 + $0x4a] sm:$0x3] }
   0xd   :  { %v1173_v19 = vld [vmem:[%s1811_s0 + $0x48] sm:$0x3]  ;;  %453 = vst [vmem:[#allocation0 + $0x130] sm:$0x3] %v1171_v17  ;;  %458 = vst [vmem:[#allocation0 + $0x128] sm:$0x3] %v1172_v18 }
   0xe   :  { %463 = vst [vmem:[#allocation0 + $0x120] sm:$0x3] %v1173_v19  ;;  %v1174_v20 = vld [vmem:[%s1811_s0 + $0x46] sm:$0x3]  ;;  %v1175_v21 = vld [vmem:[%s1811_s0 + $0x44] sm:$0x3] }
   0xf   :  { %v1176_v22 = vld [vmem:[%s1811_s0 + $0x42] sm:$0x3]  ;;  %468 = vst [vmem:[#allocation0 + $0x118] sm:$0x3] %v1174_v20  ;;  %473 = vst [vmem:[#allocation0 + $0x110] sm:$0x3] %v1175_v21 }
  0x10   :  { %478 = vst [vmem:[#allocation0 + $0x108] sm:$0x3] %v1176_v22  ;;  %v1177_v23 = vld [vmem:[%s1811_s0 + $0x40] sm:$0x3]  ;;  %v1106_v24 = vld [vmem:[%s1811_s0 + $0xce] sm:$0x3] }
  0x11   :  { %v1107_v25 = vld [vmem:[%s1811_s0 + $0xcc] sm:$0x3]  ;;  %v784_v26 = vld [vmem:[#allocation0 + $0x1] ss:$8 sm:$0xf0]  }
  0x12   :  { %483 = vst [vmem:[#allocation0 + $0x100] sm:$0x3] %v1177_v23  ;;  %128 = vst [vmem:[#allocation0 + $0x338] sm:$0x3] %v1106_v24  ;;  %v1108_v27 = vld [vmem:[%s1811_s0 + $0xca] sm:$0x3] }
  0x13   :  { %133 = vst [vmem:[#allocation0 + $0x330] sm:$0x3] %v1107_v25  ;;  %v782_v28 = vld [vmem:[#allocation0 + $0x1] ss:$8 sm:$0xf]  }
  0x14   :  { %138 = vst [vmem:[#allocation0 + $0x328] sm:$0x3] %v1108_v27  ;;  %v1109_v29 = vld [vmem:[%s1811_s0 + $0xc8] sm:$0x3]  ;;  %v786_v30 = vsel %vm642_vm0, %v784_v26, %v782_v28  ;;  %v1110_v31 = vld [vmem:[%s1811_s0 + $0xc6] sm:$0x3] }
  0x15   :  { %143 = vst [vmem:[#allocation0 + $0x320] sm:$0x3] %v1109_v29  ;;  %v1111_v32 = vld [vmem:[%s1811_s0 + $0xc4] sm:$0x3]  ;;  %v1112_v33 = vld [vmem:[%s1811_s0 + $0xc2] sm:$0x3]  ;;  %787 = vrot.lane.b32.xlu0 %v786_v30, %s1240_s10 }
  0x16   :  { %v805_v34 = vld [vmem:[#allocation0 + $0x201] ss:$8 sm:$0xf0]   ;;  %148 = vst [vmem:[#allocation0 + $0x318] sm:$0x3] %v1110_v31 }
  0x17   :  { %153 = vst [vmem:[#allocation0 + $0x310] sm:$0x3] %v1111_v32  ;;  %158 = vst [vmem:[#allocation0 + $0x308] sm:$0x3] %v1112_v33  ;;  %v1113_v35 = vld [vmem:[%s1811_s0 + $0xc0] sm:$0x3] }
  0x18   :  { %v803_v36 = vld [vmem:[#allocation0 + $0x201] ss:$8 sm:$0xf]   ;;  %163 = vst [vmem:[#allocation0 + $0x300] sm:$0x3] %v1113_v35 }
  0x19   :  { %v1194_v37 = vld [vmem:[%s1811_s0 + $0x1e] sm:$0x3]  ;;  %v807_v38 = vsel %vm642_vm0, %v805_v34, %v803_v36  ;;  %v794_v39 = vld [vmem:[#allocation0 + $0x101] ss:$8 sm:$0xf0]  }
  0x1a   :  { %568 = vst [vmem:[#allocation0 + $0x78] sm:$0x3] %v1194_v37  ;;  %v1195_v40 = vld [vmem:[%s1811_s0 + $0x1c] sm:$0x3]  ;;  %808 = vrot.lane.b32.xlu1 %v807_v38, %s1240_s10  ;;  %v1196_v41 = vld [vmem:[%s1811_s0 + $0x1a] sm:$0x3] }
  0x1b   :  { %573 = vst [vmem:[#allocation0 + $0x70] sm:$0x3] %v1195_v40  ;;  %v1197_v42 = vld [vmem:[%s1811_s0 + $0x18] sm:$0x3]  ;;  %v1198_v43 = vld [vmem:[%s1811_s0 + $0x16] sm:$0x3] }
  0x1c   :  { %v792_v44 = vld [vmem:[#allocation0 + $0x101] ss:$8 sm:$0xf]   ;;  %578 = vst [vmem:[#allocation0 + $0x68] sm:$0x3] %v1196_v41 }
  0x1d   :  { %583 = vst [vmem:[#allocation0 + $0x60] sm:$0x3] %v1197_v42  ;;  %588 = vst [vmem:[#allocation0 + $0x58] sm:$0x3] %v1198_v43  ;;  %v1199_v45 = vld [vmem:[%s1811_s0 + $0x14] sm:$0x3]  ;;  %v796_v46 = vsel %vm642_vm0, %v794_v39, %v792_v44 }
  0x1e   :  { %593 = vst [vmem:[#allocation0 + $0x50] sm:$0x3] %v1199_v45  ;;  %v1200_v47 = vld [vmem:[%s1811_s0 + $0x12] sm:$0x3]  ;;  %v1201_v48 = vld [vmem:[%s1811_s0 + $0x10] sm:$0x3]  ;;  %797 = vrot.lane.b32.xlu0 %v796_v46, %s1240_s10 }
  0x1f   :  { %v1162_v49 = vld [vmem:[%s1811_s0 + $0x5e] sm:$0x3]  ;;  %v816_v50 = vld [vmem:[#allocation0 + $0x301] ss:$8 sm:$0xf0]  }
  0x20   :  { %598 = vst [vmem:[#allocation0 + $0x48] sm:$0x3] %v1200_v47  ;;  %603 = vst [vmem:[#allocation0 + $0x40] sm:$0x3] %v1201_v48  ;;  %v1163_v51 = vld [vmem:[%s1811_s0 + $0x5c] sm:$0x3] }
  0x21   :  { %408 = vst [vmem:[#allocation0 + $0x178] sm:$0x3] %v1162_v49  ;;  %413 = vst [vmem:[#allocation0 + $0x170] sm:$0x3] %v1163_v51  ;;  %v1164_v52 = vld [vmem:[%s1811_s0 + $0x5a] sm:$0x3] }
  0x22   :  { %v1165_v53 = vld [vmem:[%s1811_s0 + $0x58] sm:$0x3]  ;;  %v1166_v54 = vld [vmem:[%s1811_s0 + $0x56] sm:$0x3]  ;;  %418 = vst [vmem:[#allocation0 + $0x168] sm:$0x3] %v1164_v52 }
  0x23   :  { %v814_v55 = vld [vmem:[#allocation0 + $0x301] ss:$8 sm:$0xf]   ;;  %423 = vst [vmem:[#allocation0 + $0x160] sm:$0x3] %v1165_v53 }
  0x24   :  { %428 = vst [vmem:[#allocation0 + $0x158] sm:$0x3] %v1166_v54  ;;  %v1167_v56 = vld [vmem:[%s1811_s0 + $0x54] sm:$0x3]  ;;  %v818_v57 = vsel %vm642_vm0, %v816_v50, %v814_v55  ;;  %v1168_v58 = vld [vmem:[%s1811_s0 + $0x52] sm:$0x3] }
  0x25   :  { %433 = vst [vmem:[#allocation0 + $0x150] sm:$0x3] %v1167_v56  ;;  %v1169_v59 = vld [vmem:[%s1811_s0 + $0x50] sm:$0x3]  ;;  %v1130_v60 = vld [vmem:[%s1811_s0 + $0x9e] sm:$0x3]  ;;  %819 = vrot.lane.b32.xlu1 %v818_v57, %s1240_s10 }
  0x26   :  { %438 = vst [vmem:[#allocation0 + $0x148] sm:$0x3] %v1168_v58  ;;  %443 = vst [vmem:[#allocation0 + $0x140] sm:$0x3] %v1169_v59  ;;  %v1131_v61 = vld [vmem:[%s1811_s0 + $0x9c] sm:$0x3] }
  0x27   :  { %248 = vst [vmem:[#allocation0 + $0x278] sm:$0x3] %v1130_v60  ;;  %v1132_v62 = vld [vmem:[%s1811_s0 + $0x9a] sm:$0x3]  ;;  %v1133_v63 = vld [vmem:[%s1811_s0 + $0x98] sm:$0x3] }
  0x28   :  { %v827_v0 = vld [vmem:[#allocation0 + $0x41] ss:$8 sm:$0xf0]   ;;  %253 = vst [vmem:[#allocation0 + $0x270] sm:$0x3] %v1131_v61 }
  0x29   :  { %258 = vst [vmem:[#allocation0 + $0x268] sm:$0x3] %v1132_v62  ;;  %263 = vst [vmem:[#allocation0 + $0x260] sm:$0x3] %v1133_v63  ;;  %v1134_v1 = vld [vmem:[%s1811_s0 + $0x96] sm:$0x3] }
  0x2a   :  { %268 = vst [vmem:[#allocation0 + $0x258] sm:$0x3] %v1134_v1  ;;  %v1135_v2 = vld [vmem:[%s1811_s0 + $0x94] sm:$0x3]  ;;  %v1136_v3 = vld [vmem:[%s1811_s0 + $0x92] sm:$0x3] }
  0x2b   :  { %v1137_v4 = vld [vmem:[%s1811_s0 + $0x90] sm:$0x3]  ;;  %273 = vst [vmem:[#allocation0 + $0x250] sm:$0x3] %v1135_v2  ;;  %278 = vst [vmem:[#allocation0 + $0x248] sm:$0x3] %v1136_v3 }
  0x2c   :  { %v825_v5 = vld [vmem:[#allocation0 + $0x41] ss:$8 sm:$0xf]   ;;  %283 = vst [vmem:[#allocation0 + $0x240] sm:$0x3] %v1137_v4 }
  0x2d   :  { %v1098_v6 = vld [vmem:[%s1811_s0 + $0xde] sm:$0x3]  ;;  %v829_v7 = vsel %vm642_vm0, %v827_v0, %v825_v5  ;;  %v1099_v8 = vld [vmem:[%s1811_s0 + $0xdc] sm:$0x3]  ;;  %v1100_v9 = vld [vmem:[%s1811_s0 + $0xda] sm:$0x3] }
  0x2e   :  { %88 = vst [vmem:[#allocation0 + $0x378] sm:$0x3] %v1098_v6  ;;  %v1101_v10 = vld [vmem:[%s1811_s0 + $0xd8] sm:$0x3]  ;;  %830 = vrot.lane.b32.xlu0 %v829_v7, %s1240_s10  ;;  %93 = vst [vmem:[#allocation0 + $0x370] sm:$0x3] %v1099_v8 }
  0x2f   :  { %v838_v11 = vld [vmem:[#allocation0 + $0x141] ss:$8 sm:$0xf0]   ;;  %98 = vst [vmem:[#allocation0 + $0x368] sm:$0x3] %v1100_v9 }
  0x30   :  { %103 = vst [vmem:[#allocation0 + $0x360] sm:$0x3] %v1101_v10  ;;  %v1102_v12 = vld [vmem:[%s1811_s0 + $0xd6] sm:$0x3]  ;;  %v1103_v13 = vld [vmem:[%s1811_s0 + $0xd4] sm:$0x3] }
  0x31   :  { %108 = vst [vmem:[#allocation0 + $0x358] sm:$0x3] %v1102_v12  ;;  %v1104_v14 = vld [vmem:[%s1811_s0 + $0xd2] sm:$0x3]  ;;  %v1105_v15 = vld [vmem:[%s1811_s0 + $0xd0] sm:$0x3] }
  0x32   :  { %v836_v16 = vld [vmem:[#allocation0 + $0x141] ss:$8 sm:$0xf]   ;;  %113 = vst [vmem:[#allocation0 + $0x350] sm:$0x3] %v1103_v13 }
  0x33   :  { %118 = vst [vmem:[#allocation0 + $0x348] sm:$0x3] %v1104_v14  ;;  %123 = vst [vmem:[#allocation0 + $0x340] sm:$0x3] %v1105_v15  ;;  %v1186_v17 = vld [vmem:[%s1811_s0 + $0x2e] sm:$0x3]  ;;  %v840_v18 = vsel %vm642_vm0, %v838_v11, %v836_v16 }
  0x34   :  { %v849_v19 = vld [vmem:[#allocation0 + $0x241] ss:$8 sm:$0xf0]   ;;  %528 = vst [vmem:[#allocation0 + $0xb8] sm:$0x3] %v1186_v17  ;;  %841 = vrot.lane.b32.xlu1 %v840_v18, %s1240_s10 }
  0x35   :  { %v1187_v20 = vld [vmem:[%s1811_s0 + $0x2c] sm:$0x3]  ;;  %v1188_v21 = vld [vmem:[%s1811_s0 + $0x2a] sm:$0x3]  ;;  %v1189_v22 = vld [vmem:[%s1811_s0 + $0x28] sm:$0x3] }
  0x36   :  { %533 = vst [vmem:[#allocation0 + $0xb0] sm:$0x3] %v1187_v20  ;;  %v1190_v23 = vld [vmem:[%s1811_s0 + $0x26] sm:$0x3]  ;;  %538 = vst [vmem:[#allocation0 + $0xa8] sm:$0x3] %v1188_v21 }
  0x37   :  { %v847_v24 = vld [vmem:[#allocation0 + $0x241] ss:$8 sm:$0xf]   ;;  %543 = vst [vmem:[#allocation0 + $0xa0] sm:$0x3] %v1189_v22 }
  0x38   :  { %548 = vst [vmem:[#allocation0 + $0x98] sm:$0x3] %v1190_v23  ;;  %v1191_v25 = vld [vmem:[%s1811_s0 + $0x24] sm:$0x3]  ;;  %v851_v26 = vsel %vm642_vm0, %v849_v19, %v847_v24  ;;  %v1192_v27 = vld [vmem:[%s1811_s0 + $0x22] sm:$0x3] }
  0x39   :  { %553 = vst [vmem:[#allocation0 + $0x90] sm:$0x3] %v1191_v25  ;;  %v1193_v28 = vld [vmem:[%s1811_s0 + $0x20] sm:$0x3]  ;;  %v1154_v29 = vld [vmem:[%s1811_s0 + $0x6e] sm:$0x3]  ;;  %852 = vrot.lane.b32.xlu0 %v851_v26, %s1240_s10 }
  0x3a   :  { %v860_v30 = vld [vmem:[#allocation0 + $0x341] ss:$8 sm:$0xf0]   ;;  %558 = vst [vmem:[#allocation0 + $0x88] sm:$0x3] %v1192_v27 }
  0x3b   :  { %563 = vst [vmem:[#allocation0 + $0x80] sm:$0x3] %v1193_v28  ;;  %368 = vst [vmem:[#allocation0 + $0x1b8] sm:$0x3] %v1154_v29  ;;  %v1155_v31 = vld [vmem:[%s1811_s0 + $0x6c] sm:$0x3] }
  0x3c   :  { %373 = vst [vmem:[#allocation0 + $0x1b0] sm:$0x3] %v1155_v31  ;;  %v1156_v32 = vld [vmem:[%s1811_s0 + $0x6a] sm:$0x3]  ;;  %v1157_v33 = vld [vmem:[%s1811_s0 + $0x68] sm:$0x3] }
  0x3d   :  { %v1158_v34 = vld [vmem:[%s1811_s0 + $0x66] sm:$0x3]  ;;  %v858_v35 = vld [vmem:[#allocation0 + $0x341] ss:$8 sm:$0xf]  }
  0x3e   :  { %378 = vst [vmem:[#allocation0 + $0x1a8] sm:$0x3] %v1156_v32  ;;  %383 = vst [vmem:[#allocation0 + $0x1a0] sm:$0x3] %v1157_v33  ;;  %v1159_v36 = vld [vmem:[%s1811_s0 + $0x64] sm:$0x3]  ;;  %v862_v37 = vsel %vm642_vm0, %v860_v30, %v858_v35 }
  0x3f   :  { %388 = vst [vmem:[#allocation0 + $0x198] sm:$0x3] %v1158_v34  ;;  %393 = vst [vmem:[#allocation0 + $0x190] sm:$0x3] %v1159_v36  ;;  %v1160_v38 = vld [vmem:[%s1811_s0 + $0x62] sm:$0x3]  ;;  %863 = vrot.lane.b32.xlu1 %v862_v37, %s1240_s10 }
  0x40   :  { %v1161_v39 = vld [vmem:[%s1811_s0 + $0x60] sm:$0x3]  ;;  %v1122_v40 = vld [vmem:[%s1811_s0 + $0xae] sm:$0x3]  ;;  %398 = vst [vmem:[#allocation0 + $0x188] sm:$0x3] %v1160_v38 }
  0x41   :  { %403 = vst [vmem:[#allocation0 + $0x180] sm:$0x3] %v1161_v39  ;;  %208 = vst [vmem:[#allocation0 + $0x2b8] sm:$0x3] %v1122_v40  ;;  %v1123_v41 = vld [vmem:[%s1811_s0 + $0xac] sm:$0x3] }
  0x42   :  { %v1124_v42 = vld [vmem:[%s1811_s0 + $0xaa] sm:$0x3]  ;;  %v1125_v43 = vld [vmem:[%s1811_s0 + $0xa8] sm:$0x3]  ;;  %213 = vst [vmem:[#allocation0 + $0x2b0] sm:$0x3] %v1123_v41 }
  0x43   :  { %v871_v44 = vld [vmem:[#allocation0 + $0x81] ss:$8 sm:$0xf0]   ;;  %218 = vst [vmem:[#allocation0 + $0x2a8] sm:$0x3] %v1124_v42 }
  0x44   :  { %223 = vst [vmem:[#allocation0 + $0x2a0] sm:$0x3] %v1125_v43  ;;  %v1126_v45 = vld [vmem:[%s1811_s0 + $0xa6] sm:$0x3]  ;;  %v1127_v46 = vld [vmem:[%s1811_s0 + $0xa4] sm:$0x3] }
  0x45   :  { %228 = vst [vmem:[#allocation0 + $0x298] sm:$0x3] %v1126_v45  ;;  %v1128_v47 = vld [vmem:[%s1811_s0 + $0xa2] sm:$0x3]  ;;  %v1129_v48 = vld [vmem:[%s1811_s0 + $0xa0] sm:$0x3] }
  0x46   :  { %v869_v49 = vld [vmem:[#allocation0 + $0x81] ss:$8 sm:$0xf]   ;;  %233 = vst [vmem:[#allocation0 + $0x290] sm:$0x3] %v1127_v46 }
  0x47   :  { %238 = vst [vmem:[#allocation0 + $0x288] sm:$0x3] %v1128_v47  ;;  %243 = vst [vmem:[#allocation0 + $0x280] sm:$0x3] %v1129_v48  ;;  %v1090_v50 = vld [vmem:[%s1811_s0 + $0xee] sm:$0x3]  ;;  %v873_v51 = vsel %vm642_vm0, %v871_v44, %v869_v49 }
  0x48   :  { %48 = vst [vmem:[#allocation0 + $0x3b8] sm:$0x3] %v1090_v50  ;;  %v1091_v52 = vld [vmem:[%s1811_s0 + $0xec] sm:$0x3]  ;;  %v1092_v53 = vld [vmem:[%s1811_s0 + $0xea] sm:$0x3]  ;;  %874 = vrot.lane.b32.xlu0 %v873_v51, %s1240_s10 }
  0x49   :  { %v1093_v54 = vld [vmem:[%s1811_s0 + $0xe8] sm:$0x3]  ;;  %53 = vst [vmem:[#allocation0 + $0x3b0] sm:$0x3] %v1091_v52  ;;  %58 = vst [vmem:[#allocation0 + $0x3a8] sm:$0x3] %v1092_v53 }
  0x4a   :  { %v882_v55 = vld [vmem:[#allocation0 + $0x181] ss:$8 sm:$0xf0]   ;;  %63 = vst [vmem:[#allocation0 + $0x3a0] sm:$0x3] %v1093_v54 }
  0x4b   :  { %v1094_v56 = vld [vmem:[%s1811_s0 + $0xe6] sm:$0x3]  ;;  %v1095_v57 = vld [vmem:[%s1811_s0 + $0xe4] sm:$0x3]  ;;  %v1096_v58 = vld [vmem:[%s1811_s0 + $0xe2] sm:$0x3] }
  0x4c   :  { %68 = vst [vmem:[#allocation0 + $0x398] sm:$0x3] %v1094_v56  ;;  %v1097_v59 = vld [vmem:[%s1811_s0 + $0xe0] sm:$0x3]  ;;  %73 = vst [vmem:[#allocation0 + $0x390] sm:$0x3] %v1095_v57 }
  0x4d   :  { %v880_v60 = vld [vmem:[#allocation0 + $0x181] ss:$8 sm:$0xf]   ;;  %78 = vst [vmem:[#allocation0 + $0x388] sm:$0x3] %v1096_v58 }
  0x4e   :  { %83 = vst [vmem:[#allocation0 + $0x380] sm:$0x3] %v1097_v59  ;;  %v1178_v61 = vld [vmem:[%s1811_s0 + $0x3e] sm:$0x3]  ;;  %v884_v62 = vsel %vm642_vm0, %v882_v55, %v880_v60  ;;  %v1179_v0 = vld [vmem:[%s1811_s0 + $0x3c] sm:$0x3] }
  0x4f   :  { %v893_v63 = vld [vmem:[#allocation0 + $0x281] ss:$8 sm:$0xf0]   ;;  %488 = vst [vmem:[#allocation0 + $0xf8] sm:$0x3] %v1178_v61  ;;  %885 = vrot.lane.b32.xlu1 %v884_v62, %s1240_s10 }
  0x50   :  { %493 = vst [vmem:[#allocation0 + $0xf0] sm:$0x3] %v1179_v0  ;;  %v1180_v1 = vld [vmem:[%s1811_s0 + $0x3a] sm:$0x3]  ;;  %v1181_v2 = vld [vmem:[%s1811_s0 + $0x38] sm:$0x3] }
  0x51   :  { %v1182_v3 = vld [vmem:[%s1811_s0 + $0x36] sm:$0x3]  ;;  %v891_v4 = vld [vmem:[#allocation0 + $0x281] ss:$8 sm:$0xf]  }
  0x52   :  { %498 = vst [vmem:[#allocation0 + $0xe8] sm:$0x3] %v1180_v1  ;;  %503 = vst [vmem:[#allocation0 + $0xe0] sm:$0x3] %v1181_v2  ;;  %v1183_v5 = vld [vmem:[%s1811_s0 + $0x34] sm:$0x3]  ;;  %v895_v6 = vsel %vm642_vm0, %v893_v63, %v891_v4 }
  0x53   :  { %508 = vst [vmem:[#allocation0 + $0xd8] sm:$0x3] %v1182_v3  ;;  %513 = vst [vmem:[#allocation0 + $0xd0] sm:$0x3] %v1183_v5  ;;  %v1184_v7 = vld [vmem:[%s1811_s0 + $0x32] sm:$0x3]  ;;  %896 = vrot.lane.b32.xlu0 %v895_v6, %s1240_s10 }
  0x54   :  { %v1185_v8 = vld [vmem:[%s1811_s0 + $0x30] sm:$0x3]  ;;  %v1146_v9 = vld [vmem:[%s1811_s0 + $0x7e] sm:$0x3]  ;;  %518 = vst [vmem:[#allocation0 + $0xc8] sm:$0x3] %v1184_v7 }
  0x55   :  { %v904_v10 = vld [vmem:[#allocation0 + $0x381] ss:$8 sm:$0xf0]   ;;  %523 = vst [vmem:[#allocation0 + $0xc0] sm:$0x3] %v1185_v8 }
  0x56   :  { %328 = vst [vmem:[#allocation0 + $0x1f8] sm:$0x3] %v1146_v9  ;;  %v1147_v11 = vld [vmem:[%s1811_s0 + $0x7c] sm:$0x3]  ;;  %v1148_v12 = vld [vmem:[%s1811_s0 + $0x7a] sm:$0x3] }
  0x57   :  { %333 = vst [vmem:[#allocation0 + $0x1f0] sm:$0x3] %v1147_v11  ;;  %v1149_v13 = vld [vmem:[%s1811_s0 + $0x78] sm:$0x3]  ;;  %v1150_v14 = vld [vmem:[%s1811_s0 + $0x76] sm:$0x3] }
  0x58   :  { %v902_v15 = vld [vmem:[#allocation0 + $0x381] ss:$8 sm:$0xf]   ;;  %338 = vst [vmem:[#allocation0 + $0x1e8] sm:$0x3] %v1148_v12 }
  0x59   :  { %343 = vst [vmem:[#allocation0 + $0x1e0] sm:$0x3] %v1149_v13  ;;  %348 = vst [vmem:[#allocation0 + $0x1d8] sm:$0x3] %v1150_v14  ;;  %v1151_v16 = vld [vmem:[%s1811_s0 + $0x74] sm:$0x3]  ;;  %v906_v17 = vsel %vm642_vm0, %v904_v10, %v902_v15 }
  0x5a   :  { %353 = vst [vmem:[#allocation0 + $0x1d0] sm:$0x3] %v1151_v16  ;;  %v1152_v18 = vld [vmem:[%s1811_s0 + $0x72] sm:$0x3]  ;;  %v1153_v19 = vld [vmem:[%s1811_s0 + $0x70] sm:$0x3]  ;;  %907 = vrot.lane.b32.xlu1 %v906_v17, %s1240_s10 }
  0x5b   :  { %v1114_v20 = vld [vmem:[%s1811_s0 + $0xbe] sm:$0x3]  ;;  %358 = vst [vmem:[#allocation0 + $0x1c8] sm:$0x3] %v1152_v18  ;;  %363 = vst [vmem:[#allocation0 + $0x1c0] sm:$0x3] %v1153_v19 }
  0x5c   :  { %168 = vst [vmem:[#allocation0 + $0x2f8] sm:$0x3] %v1114_v20  ;;  %v1115_v21 = vld [vmem:[%s1811_s0 + $0xbc] sm:$0x3]  ;;  %v1116_v22 = vld [vmem:[%s1811_s0 + $0xba] sm:$0x3] }
  0x5d   :  { %v1117_v23 = vld [vmem:[%s1811_s0 + $0xb8] sm:$0x3]  ;;  %173 = vst [vmem:[#allocation0 + $0x2f0] sm:$0x3] %v1115_v21  ;;  %178 = vst [vmem:[#allocation0 + $0x2e8] sm:$0x3] %v1116_v22 }
  0x5e   :  { %v915_v24 = vld [vmem:[#allocation0 + $0xc1] ss:$8 sm:$0xf0]   ;;  %183 = vst [vmem:[#allocation0 + $0x2e0] sm:$0x3] %v1117_v23 }
  0x5f   :  { %v1118_v25 = vld [vmem:[%s1811_s0 + $0xb6] sm:$0x3]  ;;  %v1119_v26 = vld [vmem:[%s1811_s0 + $0xb4] sm:$0x3]  ;;  %v1120_v27 = vld [vmem:[%s1811_s0 + $0xb2] sm:$0x3] }
  0x60   :  { %188 = vst [vmem:[#allocation0 + $0x2d8] sm:$0x3] %v1118_v25  ;;  %v1121_v28 = vld [vmem:[%s1811_s0 + $0xb0] sm:$0x3]  ;;  %193 = vst [vmem:[#allocation0 + $0x2d0] sm:$0x3] %v1119_v26 }
  0x61   :  { %v913_v29 = vld [vmem:[#allocation0 + $0xc1] ss:$8 sm:$0xf]   ;;  %198 = vst [vmem:[#allocation0 + $0x2c8] sm:$0x3] %v1120_v27 }
  0x62   :  { %203 = vst [vmem:[#allocation0 + $0x2c0] sm:$0x3] %v1121_v28  ;;  %v1082_v30 = vld [vmem:[%s1811_s0 + $0xfe] sm:$0x3]  ;;  %v917_v31 = vsel %vm642_vm0, %v915_v24, %v913_v29  ;;  %v1083_v32 = vld [vmem:[%s1811_s0 + $0xfc] sm:$0x3] }
  0x63   :  { %8 = vst [vmem:[#allocation0 + $0x3f8] sm:$0x3] %v1082_v30  ;;  %v1084_v33 = vld [vmem:[%s1811_s0 + $0xfa] sm:$0x3]  ;;  %v1085_v34 = vld [vmem:[%s1811_s0 + $0xf8] sm:$0x3]  ;;  %918 = vrot.lane.b32.xlu0 %v917_v31, %s1240_s10 }
  0x64   :  { %v926_v35 = vld [vmem:[#allocation0 + $0x1c1] ss:$8 sm:$0xf0]   ;;  %13 = vst [vmem:[#allocation0 + $0x3f0] sm:$0x3] %v1083_v32 }
  0x65   :  { %18 = vst [vmem:[#allocation0 + $0x3e8] sm:$0x3] %v1084_v33  ;;  %23 = vst [vmem:[#allocation0 + $0x3e0] sm:$0x3] %v1085_v34  ;;  %v1086_v36 = vld [vmem:[%s1811_s0 + $0xf6] sm:$0x3] }
  0x66   :  { %28 = vst [vmem:[#allocation0 + $0x3d8] sm:$0x3] %v1086_v36  ;;  %v1087_v37 = vld [vmem:[%s1811_s0 + $0xf4] sm:$0x3]  ;;  %v1088_v38 = vld [vmem:[%s1811_s0 + $0xf2] sm:$0x3] }
  0x67   :  { %v1089_v39 = vld [vmem:[%s1811_s0 + $0xf0] sm:$0x3]  ;;  %33 = vst [vmem:[#allocation0 + $0x3d0] sm:$0x3] %v1087_v37  ;;  %38 = vst [vmem:[#allocation0 + $0x3c8] sm:$0x3] %v1088_v38 }
  0x68   :  { %v924_v40 = vld [vmem:[#allocation0 + $0x1c1] ss:$8 sm:$0xf]   ;;  %43 = vst [vmem:[#allocation0 + $0x3c0] sm:$0x3] %v1089_v39 }
  0x69   :  { %v640_v41 = vld [vmem:[#allocation0] ss:$8 sm:$0xf]   ;;  %v928_v42 = vsel %vm642_vm0, %v926_v35, %v924_v40  ;;  %v937_v43 = vld [vmem:[#allocation0 + $0x2c1] ss:$8 sm:$0xf0]  }
  0x6a   :  { %v641_v44 = vld [vmem:[#allocation0] ss:$8 sm:$0xf0]   ;;  %929 = vrot.lane.b32.xlu1 %v928_v42, %s1240_s10  ;;  %v935_v48 = vld [vmem:[#allocation0 + $0x2c1] ss:$8 sm:$0xf]  }
  0x6b   :  { %v643_v45 = vsel %vm642_vm0, %v641_v44, %v640_v41  ;;  %v710_v46 = vld [vmem:[#allocation0 + $0x200] ss:$8 sm:$0xf]   ;;  %v939_v51 = vsel %vm642_vm0, %v937_v43, %v935_v48 }
  0x6c   :  { %v712_v47 = vld [vmem:[#allocation0 + $0x200] ss:$8 sm:$0xf0]   ;;  %645 = vst.msk [vmem:[%s1812_s1] sm:$0xff] %vm644_vm1, %v643_v45   ;;  %940 = vrot.lane.b32.xlu0 %v939_v51, %s1240_s10 }
  0x6d   :  { %v714_v49 = vsel %vm642_vm0, %v712_v47, %v710_v46  ;;  %v674_v50 = vld [vmem:[#allocation0 + $0x100] ss:$8 sm:$0xf]   ;;  %v948_v54 = vld [vmem:[#allocation0 + $0x3c1] ss:$8 sm:$0xf0]  }
  0x6e   :  { %1216 = vst.msk [vmem:[%s1812_s1 + $0x40] sm:$0xff] %vm644_vm1, %v714_v49   ;;  %v676_v52 = vld [vmem:[#allocation0 + $0x100] ss:$8 sm:$0xf0]  }
  0x6f   :  { %v746_v53 = vld [vmem:[#allocation0 + $0x300] ss:$8 sm:$0xf]   ;;  %v678_v55 = vsel %vm642_vm0, %v676_v52, %v674_v50  ;;  %v946_v60 = vld [vmem:[#allocation0 + $0x3c1] ss:$8 sm:$0xf]  }
  0x70   :  { %v748_v56 = vld [vmem:[#allocation0 + $0x300] ss:$8 sm:$0xf0]   ;;  %1212 = vst.msk [vmem:[%s1812_s1 + $0x20] sm:$0xff] %vm644_vm1, %v678_v55   ;;  %v950_v63 = vsel %vm642_vm0, %v948_v54, %v946_v60 }
  0x71   :  { %v750_v57 = vsel %vm642_vm0, %v748_v56, %v746_v53  ;;  %v647_v58 = vld [vmem:[#allocation0 + $0x40] ss:$8 sm:$0xf]   ;;  %951 = vrot.lane.b32.xlu1 %v950_v63, %s1240_s10 }
  0x72   :  { %v649_v59 = vld [vmem:[#allocation0 + $0x40] ss:$8 sm:$0xf0]   ;;  %1220 = vst.msk [vmem:[%s1812_s1 + $0x60] sm:$0xff] %vm644_vm1, %v750_v57  }
  0x73   :  { %v651_v61 = vsel %vm642_vm0, %v649_v59, %v647_v58  ;;  %v683_v62 = vld [vmem:[#allocation0 + $0x140] ss:$8 sm:$0xf]  }
  0x74   :  { %1209 = vst.msk [vmem:[%s1812_s1 + $0x8] sm:$0xff] %vm644_vm1, %v651_v61   ;;  %v685_v0 = vld [vmem:[#allocation0 + $0x140] ss:$8 sm:$0xf0]  }
  0x75   :  { %v719_v1 = vld [vmem:[#allocation0 + $0x240] ss:$8 sm:$0xf]   ;;  %v687_v2 = vsel %vm642_vm0, %v685_v0, %v683_v62 }
  0x76   :  { %v721_v3 = vld [vmem:[#allocation0 + $0x240] ss:$8 sm:$0xf0]   ;;  %1213 = vst.msk [vmem:[%s1812_s1 + $0x28] sm:$0xff] %vm644_vm1, %v687_v2  }
  0x77   :  { %v755_v4 = vld [vmem:[#allocation0 + $0x340] ss:$8 sm:$0xf]   ;;  %v723_v5 = vsel %vm642_vm0, %v721_v3, %v719_v1 }
  0x78   :  { %v757_v6 = vld [vmem:[#allocation0 + $0x340] ss:$8 sm:$0xf0]   ;;  %1217 = vst.msk [vmem:[%s1812_s1 + $0x48] sm:$0xff] %vm644_vm1, %v723_v5  }
  0x79   :  { %v656_v7 = vld [vmem:[#allocation0 + $0x80] ss:$8 sm:$0xf]   ;;  %v759_v8 = vsel %vm642_vm0, %v757_v6, %v755_v4 }
  0x7a   :  { %v658_v9 = vld [vmem:[#allocation0 + $0x80] ss:$8 sm:$0xf0]   ;;  %1221 = vst.msk [vmem:[%s1812_s1 + $0x68] sm:$0xff] %vm644_vm1, %v759_v8  }
  0x7b   :  { %v692_v10 = vld [vmem:[#allocation0 + $0x180] ss:$8 sm:$0xf]   ;;  %v660_v11 = vsel %vm642_vm0, %v658_v9, %v656_v7 }
  0x7c   :  { %v694_v12 = vld [vmem:[#allocation0 + $0x180] ss:$8 sm:$0xf0]   ;;  %1210 = vst.msk [vmem:[%s1812_s1 + $0x10] sm:$0xff] %vm644_vm1, %v660_v11  }
  0x7d   :  { %v728_v13 = vld [vmem:[#allocation0 + $0x280] ss:$8 sm:$0xf]   ;;  %v696_v14 = vsel %vm642_vm0, %v694_v12, %v692_v10 }
  0x7e   :  { %v730_v15 = vld [vmem:[#allocation0 + $0x280] ss:$8 sm:$0xf0]   ;;  %1214 = vst.msk [vmem:[%s1812_s1 + $0x30] sm:$0xff] %vm644_vm1, %v696_v14  }
  0x7f   :  { %v764_v16 = vld [vmem:[#allocation0 + $0x380] ss:$8 sm:$0xf]   ;;  %v732_v17 = vsel %vm642_vm0, %v730_v15, %v728_v13 }
  0x80   :  { %v766_v18 = vld [vmem:[#allocation0 + $0x380] ss:$8 sm:$0xf0]   ;;  %1218 = vst.msk [vmem:[%s1812_s1 + $0x50] sm:$0xff] %vm644_vm1, %v732_v17  }
  0x81   :  { %v665_v19 = vld [vmem:[#allocation0 + $0xc0] ss:$8 sm:$0xf]   ;;  %v768_v20 = vsel %vm642_vm0, %v766_v18, %v764_v16 }
  0x82   :  { %v667_v21 = vld [vmem:[#allocation0 + $0xc0] ss:$8 sm:$0xf0]   ;;  %1222 = vst.msk [vmem:[%s1812_s1 + $0x70] sm:$0xff] %vm644_vm1, %v768_v20  }
  0x83   :  { %v701_v22 = vld [vmem:[#allocation0 + $0x1c0] ss:$8 sm:$0xf]   ;;  %v669_v23 = vsel %vm642_vm0, %v667_v21, %v665_v19 }
  0x84   :  { %v703_v24 = vld [vmem:[#allocation0 + $0x1c0] ss:$8 sm:$0xf0]   ;;  %1211 = vst.msk [vmem:[%s1812_s1 + $0x18] sm:$0xff] %vm644_vm1, %v669_v23  }
  0x85   :  { %v737_v25 = vld [vmem:[#allocation0 + $0x2c0] ss:$8 sm:$0xf]   ;;  %v705_v26 = vsel %vm642_vm0, %v703_v24, %v701_v22 }
  0x86   :  { %v739_v27 = vld [vmem:[#allocation0 + $0x2c0] ss:$8 sm:$0xf0]   ;;  %1215 = vst.msk [vmem:[%s1812_s1 + $0x38] sm:$0xff] %vm644_vm1, %v705_v26  }
  0x87   :  { %v773_v28 = vld [vmem:[#allocation0 + $0x3c0] ss:$8 sm:$0xf]   ;;  %v741_v29 = vsel %vm642_vm0, %v739_v27, %v737_v25  ;;  %v788_v32 = vpop.permute.xlu0 %787  }
  0x88   :  { %v775_v30 = vld [vmem:[#allocation0 + $0x3c0] ss:$8 sm:$0xf0]   ;;  %1219 = vst.msk [vmem:[%s1812_s1 + $0x58] sm:$0xff] %vm644_vm1, %v741_v29  }
  0x89   :  { %v777_v31 = vsel %vm642_vm0, %v775_v30, %v773_v28  ;;  %790 = vst.msk [vmem:[%s1812_s1] sm:$0xff] %vm789_vm2, %v788_v32  }
  0x8a   :  { %1223 = vst.msk [vmem:[%s1812_s1 + $0x78] sm:$0xff] %vm644_vm1, %v777_v31  }
  0x8c   :  { %v809_v33 = vpop.permute.xlu1 %808  }
  0x8d   :  { %1225 = vst.msk [vmem:[%s1812_s1 + $0x40] sm:$0xff] %vm789_vm2, %v809_v33  }
  0x90   :  { %v798_v34 = vpop.permute.xlu0 %797  }
  0x91   :  { %1224 = vst.msk [vmem:[%s1812_s1 + $0x20] sm:$0xff] %vm789_vm2, %v798_v34  }
  0x97   :  { %v820_v35 = vpop.permute.xlu1 %819  }
  0x98   :  { %1226 = vst.msk [vmem:[%s1812_s1 + $0x60] sm:$0xff] %vm789_vm2, %v820_v35  }
  0xa0   :  { %v831_v36 = vpop.permute.xlu0 %830  }
  0xa1   :  { %1227 = vst.msk [vmem:[%s1812_s1 + $0x8] sm:$0xff] %vm789_vm2, %v831_v36  }
  0xa6   :  { %v842_v37 = vpop.permute.xlu1 %841  }
  0xa7   :  { %1228 = vst.msk [vmem:[%s1812_s1 + $0x28] sm:$0xff] %vm789_vm2, %v842_v37  }
  0xab   :  { %v853_v38 = vpop.permute.xlu0 %852  }
  0xac   :  { %1229 = vst.msk [vmem:[%s1812_s1 + $0x48] sm:$0xff] %vm789_vm2, %v853_v38  }
  0xb1   :  { %v864_v39 = vpop.permute.xlu1 %863  }
  0xb2   :  { %1230 = vst.msk [vmem:[%s1812_s1 + $0x68] sm:$0xff] %vm789_vm2, %v864_v39  }
  0xba   :  { %v875_v40 = vpop.permute.xlu0 %874  }
  0xbb   :  { %1231 = vst.msk [vmem:[%s1812_s1 + $0x10] sm:$0xff] %vm789_vm2, %v875_v40  }
  0xc1   :  { %v886_v41 = vpop.permute.xlu1 %885  }
  0xc2   :  { %1232 = vst.msk [vmem:[%s1812_s1 + $0x30] sm:$0xff] %vm789_vm2, %v886_v41  }
  0xc5   :  { %v897_v42 = vpop.permute.xlu0 %896  }
  0xc6   :  { %1233 = vst.msk [vmem:[%s1812_s1 + $0x50] sm:$0xff] %vm789_vm2, %v897_v42  }
  0xcc   :  { %v908_v43 = vpop.permute.xlu1 %907  }
  0xcd   :  { %1234 = vst.msk [vmem:[%s1812_s1 + $0x70] sm:$0xff] %vm789_vm2, %v908_v43  }
  0xd5   :  { %v919_v44 = vpop.permute.xlu0 %918  }
  0xd6   :  { %1235 = vst.msk [vmem:[%s1812_s1 + $0x18] sm:$0xff] %vm789_vm2, %v919_v44  }
  0xdc   :  { %v930_v45 = vpop.permute.xlu1 %929  }
  0xdd   :  { %1236 = vst.msk [vmem:[%s1812_s1 + $0x38] sm:$0xff] %vm789_vm2, %v930_v45  }
  0xde   :  { %v941_v46 = vpop.permute.xlu0 %940  }
  0xdf   :  { %1237 = vst.msk [vmem:[%s1812_s1 + $0x58] sm:$0xff] %vm789_vm2, %v941_v46  }
  0xe3   :  { %v952_v47 = vpop.permute.xlu1 %951  }
  0xe4   :  { %1238 = vst.msk [vmem:[%s1812_s1 + $0x78] sm:$0xff] %vm789_vm2, %v952_v47  }

// kernel: spectral_transform_forward.7
= control target key start
LH: loop header
LB: loop body
LE: loop exit
PB: predicated region body
PF: predicated region fallthrough
CT: control target
= control target key end

     0   :  { %vm279_vm0 = vcmask 1043456   ;;  %vm86_vm1 = vcmask 31744   ;;  %s1507_s1 = inlined_call_operand.vmem [shape: f32[4,128], index: 1, kind: input, shape index: {}]   ;;  %s1508_s0 = inlined_call_operand.vmem [shape: f32[512,4], index: 0, kind: input, shape index: {}]   ;;  %s1509_s2 = inlined_call_operand.vmem [shape: f32[1,128], index: 2, kind: input, shape index: {}]   ;;  %s1510_s3 = inlined_call_operand.vmem [shape: f32[512,128], index: 3, kind: output, shape index: {}]  }
   0x1   :  { %v78_v0 = vld [vmem:[%s1507_s1] sm:$0xf]  ;;  %v15_v3 = vld [vmem:[%s1508_s0 + $0x8] sm:$0xff]  ;;  %v16_v5 = vld [vmem:[%s1508_s0 + $0x10] sm:$0xff] }
   0x2   :  { %v14_v1 = vld [vmem:[%s1508_s0] sm:$0xff]  ;;  %867 = vmatprep.subr.msk.mxu0 %vm279_vm0, %v78_v0  ;;  %965 = vmatprep.subr.msk.mxu1 %vm279_vm0, %v78_v0  ;;  %v47_v4 = vld [vmem:[%s1508_s0 + $0x108] sm:$0xff]  ;;  %v48_v6 = vld [vmem:[%s1508_s0 + $0x110] sm:$0xff] }
   0x3   :  { %v46_v2 = vld [vmem:[%s1508_s0 + $0x100] sm:$0xff]  ;;  %868 = vmatpush3.msk.msra.mxu0 %vm279_vm0, %v78_v0  ;;  %966 = vmatpush3.msk.msra.mxu1 %vm279_vm0, %v78_v0  ;;  %v17_v7 = vld [vmem:[%s1508_s0 + $0x18] sm:$0xff]  ;;  %v19_v11 = vld [vmem:[%s1508_s0 + $0x28] sm:$0xff] }
   0x4   :  { %869 = vmatprep.mubr.msk.f32.mxu0 %vm86_vm1, %v14_v1  ;;  %917 = vmatprep.mubr.msk.f32.mxu1 %vm86_vm1, %v46_v2  ;;  %v49_v8 = vld [vmem:[%s1508_s0 + $0x118] sm:$0xff]  ;;  %v18_v9 = vld [vmem:[%s1508_s0 + $0x20] sm:$0xff]  ;;  %v51_v12 = vld [vmem:[%s1508_s0 + $0x128] sm:$0xff] }
   0x5   :  { %870 = vmatmul.mubr.msk.f32.vlgmr.msra.gmra.mrb[0].mxu0 %vm86_vm1, %v15_v3  ;;  %918 = vmatmul.mubr.msk.f32.vlgmr.msra.gmra.mrb[0].mxu1 %vm86_vm1, %v47_v4  ;;  %v50_v10 = vld [vmem:[%s1508_s0 + $0x120] sm:$0xff]  ;;  %v20_v13 = vld [vmem:[%s1508_s0 + $0x30] sm:$0xff]  ;;  %v21_v15 = vld [vmem:[%s1508_s0 + $0x38] sm:$0xff] }
   0x6   :  { %872 = vmatprep.mubr.msk.f32.mxu0 %vm86_vm1, %v16_v5  ;;  %920 = vmatprep.mubr.msk.f32.mxu1 %vm86_vm1, %v48_v6  ;;  %v52_v14 = vld [vmem:[%s1508_s0 + $0x130] sm:$0xff]  ;;  %v53_v16 = vld [vmem:[%s1508_s0 + $0x138] sm:$0xff]  ;;  %v22_v17 = vld [vmem:[%s1508_s0 + $0x40] sm:$0xff] }
   0x7   :  { %v54_v18 = vld [vmem:[%s1508_s0 + $0x140] sm:$0xff]  ;;  %v23_v19 = vld [vmem:[%s1508_s0 + $0x48] sm:$0xff]  ;;  %v24_v21 = vld [vmem:[%s1508_s0 + $0x50] sm:$0xff] }
   0x8   :  { %v55_v20 = vld [vmem:[%s1508_s0 + $0x148] sm:$0xff]  ;;  %v56_v22 = vld [vmem:[%s1508_s0 + $0x150] sm:$0xff]  ;;  %v25_v23 = vld [vmem:[%s1508_s0 + $0x58] sm:$0xff] }
   0x9   :  { %873 = vmatmul.mubr.msk.f32.gmra.mrb[2].mxu0 %vm86_vm1, %v17_v7  ;;  %921 = vmatmul.mubr.msk.f32.gmra.mrb[2].mxu1 %vm86_vm1, %v49_v8  ;;  %v57_v24 = vld [vmem:[%s1508_s0 + $0x158] sm:$0xff]  ;;  %v26_v25 = vld [vmem:[%s1508_s0 + $0x60] sm:$0xff]  ;;  %v27_v27 = vld [vmem:[%s1508_s0 + $0x68] sm:$0xff] }
   0xa   :  { %875 = vmatprep.mubr.msk.f32.mxu0 %vm86_vm1, %v18_v9  ;;  %923 = vmatprep.mubr.msk.f32.mxu1 %vm86_vm1, %v50_v10  ;;  %v58_v26 = vld [vmem:[%s1508_s0 + $0x160] sm:$0xff]  ;;  %v59_v28 = vld [vmem:[%s1508_s0 + $0x168] sm:$0xff]  ;;  %v28_v29 = vld [vmem:[%s1508_s0 + $0x70] sm:$0xff] }
   0xb   :  { %v60_v30 = vld [vmem:[%s1508_s0 + $0x170] sm:$0xff]  ;;  %v29_v31 = vld [vmem:[%s1508_s0 + $0x78] sm:$0xff]  ;;  %v30_v33 = vld [vmem:[%s1508_s0 + $0x80] sm:$0xff] }
   0xc   :  { %v61_v32 = vld [vmem:[%s1508_s0 + $0x178] sm:$0xff]  ;;  %v62_v34 = vld [vmem:[%s1508_s0 + $0x180] sm:$0xff]  ;;  %v31_v35 = vld [vmem:[%s1508_s0 + $0x88] sm:$0xff] }
   0xd   :  { %876 = vmatmul.mubr.msk.f32.gmra.mrb[4].mxu0 %vm86_vm1, %v19_v11  ;;  %924 = vmatmul.mubr.msk.f32.gmra.mrb[4].mxu1 %vm86_vm1, %v51_v12  ;;  %v63_v36 = vld [vmem:[%s1508_s0 + $0x188] sm:$0xff]  ;;  %v32_v37 = vld [vmem:[%s1508_s0 + $0x90] sm:$0xff]  ;;  %v33_v39 = vld [vmem:[%s1508_s0 + $0x98] sm:$0xff] }
   0xe   :  { %878 = vmatprep.mubr.msk.f32.mxu0 %vm86_vm1, %v20_v13  ;;  %926 = vmatprep.mubr.msk.f32.mxu1 %vm86_vm1, %v52_v14  ;;  %v64_v38 = vld [vmem:[%s1508_s0 + $0x190] sm:$0xff]  ;;  %v65_v40 = vld [vmem:[%s1508_s0 + $0x198] sm:$0xff]  ;;  %v34_v41 = vld [vmem:[%s1508_s0 + $0xa0] sm:$0xff] }
   0xf   :  { %v66_v42 = vld [vmem:[%s1508_s0 + $0x1a0] sm:$0xff]  ;;  %v35_v43 = vld [vmem:[%s1508_s0 + $0xa8] sm:$0xff]  ;;  %v36_v45 = vld [vmem:[%s1508_s0 + $0xb0] sm:$0xff] }
  0x10   :  { %v67_v44 = vld [vmem:[%s1508_s0 + $0x1a8] sm:$0xff]  ;;  %v68_v46 = vld [vmem:[%s1508_s0 + $0x1b0] sm:$0xff]  ;;  %v37_v47 = vld [vmem:[%s1508_s0 + $0xb8] sm:$0xff] }
  0x11   :  { %879 = vmatmul.mubr.msk.f32.gmra.mrb[6].mxu0 %vm86_vm1, %v21_v15  ;;  %927 = vmatmul.mubr.msk.f32.gmra.mrb[6].mxu1 %vm86_vm1, %v53_v16  ;;  %v69_v48 = vld [vmem:[%s1508_s0 + $0x1b8] sm:$0xff]  ;;  %v38_v49 = vld [vmem:[%s1508_s0 + $0xc0] sm:$0xff]  ;;  %v39_v51 = vld [vmem:[%s1508_s0 + $0xc8] sm:$0xff] }
  0x12   :  { %881 = vmatprep.mubr.msk.f32.mxu0 %vm86_vm1, %v22_v17  ;;  %929 = vmatprep.mubr.msk.f32.mxu1 %vm86_vm1, %v54_v18  ;;  %v70_v50 = vld [vmem:[%s1508_s0 + $0x1c0] sm:$0xff]  ;;  %v71_v52 = vld [vmem:[%s1508_s0 + $0x1c8] sm:$0xff]  ;;  %v40_v53 = vld [vmem:[%s1508_s0 + $0xd0] sm:$0xff] }
  0x13   :  { %v72_v54 = vld [vmem:[%s1508_s0 + $0x1d0] sm:$0xff]  ;;  %v41_v55 = vld [vmem:[%s1508_s0 + $0xd8] sm:$0xff]  ;;  %v42_v57 = vld [vmem:[%s1508_s0 + $0xe0] sm:$0xff] }
  0x14   :  { %v73_v56 = vld [vmem:[%s1508_s0 + $0x1d8] sm:$0xff]  ;;  %v74_v58 = vld [vmem:[%s1508_s0 + $0x1e0] sm:$0xff]  ;;  %v43_v59 = vld [vmem:[%s1508_s0 + $0xe8] sm:$0xff] }
  0x15   :  { %882 = vmatmul.mubr.msk.f32.gmra.mrb[8].mxu0 %vm86_vm1, %v23_v19  ;;  %930 = vmatmul.mubr.msk.f32.gmra.mrb[8].mxu1 %vm86_vm1, %v55_v20  ;;  %v75_v60 = vld [vmem:[%s1508_s0 + $0x1e8] sm:$0xff]  ;;  %v44_v61 = vld [vmem:[%s1508_s0 + $0xf0] sm:$0xff]  ;;  %v45_v63 = vld [vmem:[%s1508_s0 + $0xf8] sm:$0xff] }
  0x16   :  { %884 = vmatprep.mubr.msk.f32.mxu0 %vm86_vm1, %v24_v21  ;;  %932 = vmatprep.mubr.msk.f32.mxu1 %vm86_vm1, %v56_v22  ;;  %v76_v62 = vld [vmem:[%s1508_s0 + $0x1f0] sm:$0xff]  ;;  %v77_v0 = vld [vmem:[%s1508_s0 + $0x1f8] sm:$0xff]  ;;  %v1249_v1 = vld [vmem:[%s1509_s2] ss:$0 sm:$0xff] }
  0x19   :  { %885 = vmatmul.mubr.msk.f32.gmra.mrb[10].mxu0 %vm86_vm1, %v25_v23  ;;  %933 = vmatmul.mubr.msk.f32.gmra.mrb[10].mxu1 %vm86_vm1, %v57_v24 }
  0x1a   :  { %887 = vmatprep.mubr.msk.f32.mxu0 %vm86_vm1, %v26_v25  ;;  %935 = vmatprep.mubr.msk.f32.mxu1 %vm86_vm1, %v58_v26 }
  0x1d   :  { %888 = vmatmul.mubr.msk.f32.gmra.mrb[12].mxu0 %vm86_vm1, %v27_v27  ;;  %936 = vmatmul.mubr.msk.f32.gmra.mrb[12].mxu1 %vm86_vm1, %v59_v28 }
  0x1e   :  { %890 = vmatprep.mubr.msk.f32.mxu0 %vm86_vm1, %v28_v29  ;;  %938 = vmatprep.mubr.msk.f32.mxu1 %vm86_vm1, %v60_v30 }
  0x21   :  { %891 = vmatmul.mubr.msk.f32.gmra.mrb[14].mxu0 %vm86_vm1, %v29_v31  ;;  %939 = vmatmul.mubr.msk.f32.gmra.mrb[14].mxu1 %vm86_vm1, %v61_v32 }
  0x22   :  { %893 = vmatprep.mubr.msk.f32.mxu0 %vm86_vm1, %v30_v33  ;;  %941 = vmatprep.mubr.msk.f32.mxu1 %vm86_vm1, %v62_v34 }
  0x25   :  { %894 = vmatmul.mubr.msk.f32.gmra.mrb[16].mxu0 %vm86_vm1, %v31_v35  ;;  %942 = vmatmul.mubr.msk.f32.gmra.mrb[16].mxu1 %vm86_vm1, %v63_v36 }
  0x26   :  { %896 = vmatprep.mubr.msk.f32.mxu0 %vm86_vm1, %v32_v37  ;;  %944 = vmatprep.mubr.msk.f32.mxu1 %vm86_vm1, %v64_v38 }
  0x29   :  { %897 = vmatmul.mubr.msk.f32.gmra.mrb[18].mxu0 %vm86_vm1, %v33_v39  ;;  %945 = vmatmul.mubr.msk.f32.gmra.mrb[18].mxu1 %vm86_vm1, %v65_v40 }
  0x2a   :  { %899 = vmatprep.mubr.msk.f32.mxu0 %vm86_vm1, %v34_v41  ;;  %947 = vmatprep.mubr.msk.f32.mxu1 %vm86_vm1, %v66_v42 }
  0x2d   :  { %900 = vmatmul.mubr.msk.f32.gmra.mrb[20].mxu0 %vm86_vm1, %v35_v43  ;;  %948 = vmatmul.mubr.msk.f32.gmra.mrb[20].mxu1 %vm86_vm1, %v67_v44 }
  0x2e   :  { %902 = vmatprep.mubr.msk.f32.mxu0 %vm86_vm1, %v36_v45  ;;  %950 = vmatprep.mubr.msk.f32.mxu1 %vm86_vm1, %v68_v46 }
  0x31   :  { %903 = vmatmul.mubr.msk.f32.gmra.mrb[22].mxu0 %vm86_vm1, %v37_v47  ;;  %951 = vmatmul.mubr.msk.f32.gmra.mrb[22].mxu1 %vm86_vm1, %v69_v48 }
  0x32   :  { %905 = vmatprep.mubr.msk.f32.mxu0 %vm86_vm1, %v38_v49  ;;  %953 = vmatprep.mubr.msk.f32.mxu1 %vm86_vm1, %v70_v50 }
  0x35   :  { %906 = vmatmul.mubr.msk.f32.gmra.mrb[24].mxu0 %vm86_vm1, %v39_v51  ;;  %954 = vmatmul.mubr.msk.f32.gmra.mrb[24].mxu1 %vm86_vm1, %v71_v52 }
  0x36   :  { %908 = vmatprep.mubr.msk.f32.mxu0 %vm86_vm1, %v40_v53  ;;  %956 = vmatprep.mubr.msk.f32.mxu1 %vm86_vm1, %v72_v54 }
  0x39   :  { %909 = vmatmul.mubr.msk.f32.gmra.mrb[26].mxu0 %vm86_vm1, %v41_v55  ;;  %957 = vmatmul.mubr.msk.f32.gmra.mrb[26].mxu1 %vm86_vm1, %v73_v56 }
  0x3a   :  { %911 = vmatprep.mubr.msk.f32.mxu0 %vm86_vm1, %v42_v57  ;;  %959 = vmatprep.mubr.msk.f32.mxu1 %vm86_vm1, %v74_v58 }
  0x3d   :  { %912 = vmatmul.mubr.msk.f32.gmra.mrb[28].mxu0 %vm86_vm1, %v43_v59  ;;  %960 = vmatmul.mubr.msk.f32.gmra.mrb[28].mxu1 %vm86_vm1, %v75_v60 }
  0x3e   :  { %914 = vmatprep.mubr.msk.f32.mxu0 %vm86_vm1, %v44_v61  ;;  %962 = vmatprep.mubr.msk.f32.mxu1 %vm86_vm1, %v76_v62 }
  0x41   :  { %915 = vmatmul.mubr.msk.f32.gmra.mrb[30].mxu0 %vm86_vm1, %v45_v63  ;;  %963 = vmatmul.mubr.msk.f32.gmra.mrb[30].mxu1 %vm86_vm1, %v77_v0 }
  0xd8   :  { %v871_v2 = vpop.f32.mrb[0].mxu0  ;;  %v919_v3 = vpop.f32.mrb[0].mxu1 }
  0xd9   :  { %v355_v4 = vadd.f32 %v871_v2, %v1249_v1  ;;  %v515_v5 = vadd.f32 %v919_v3, %v1249_v1  ;;  %v349_v6 = vpop.f32.mrb[1].mxu0  ;;  %v509_v7 = vpop.f32.mrb[1].mxu1 }
  0xda   :  { %v350_v8 = vadd.f32 %v1249_v1, %v349_v6  ;;  %v510_v9 = vadd.f32 %v1249_v1, %v509_v7 }
  0xdb   :  { %669 = vst [vmem:[%s1510_s3 + $0x8] sm:$0xff] %v355_v4  ;;  %701 = vst [vmem:[%s1510_s3 + $0x108] sm:$0xff] %v515_v5 }
  0xdc   :  { %668 = vst [vmem:[%s1510_s3] sm:$0xff] %v350_v8  ;;  %700 = vst [vmem:[%s1510_s3 + $0x100] sm:$0xff] %v510_v9  ;;  %v874_v10 = vpop.f32.mrb[2].mxu0  ;;  %v922_v11 = vpop.f32.mrb[2].mxu1 }
  0xdd   :  { %v365_v12 = vadd.f32 %v874_v10, %v1249_v1  ;;  %v525_v13 = vadd.f32 %v922_v11, %v1249_v1  ;;  %v359_v14 = vpop.f32.mrb[3].mxu0  ;;  %v519_v15 = vpop.f32.mrb[3].mxu1 }
  0xde   :  { %v360_v16 = vadd.f32 %v1249_v1, %v359_v14  ;;  %v520_v17 = vadd.f32 %v1249_v1, %v519_v15 }
  0xdf   :  { %671 = vst [vmem:[%s1510_s3 + $0x18] sm:$0xff] %v365_v12  ;;  %703 = vst [vmem:[%s1510_s3 + $0x118] sm:$0xff] %v525_v13 }
  0xe0   :  { %670 = vst [vmem:[%s1510_s3 + $0x10] sm:$0xff] %v360_v16  ;;  %702 = vst [vmem:[%s1510_s3 + $0x110] sm:$0xff] %v520_v17  ;;  %v877_v18 = vpop.f32.mrb[4].mxu0  ;;  %v925_v19 = vpop.f32.mrb[4].mxu1 }
  0xe1   :  { %v375_v20 = vadd.f32 %v877_v18, %v1249_v1  ;;  %v535_v21 = vadd.f32 %v925_v19, %v1249_v1  ;;  %v369_v22 = vpop.f32.mrb[5].mxu0  ;;  %v529_v23 = vpop.f32.mrb[5].mxu1 }
  0xe2   :  { %v370_v24 = vadd.f32 %v1249_v1, %v369_v22  ;;  %v530_v25 = vadd.f32 %v1249_v1, %v529_v23 }
  0xe3   :  { %673 = vst [vmem:[%s1510_s3 + $0x28] sm:$0xff] %v375_v20  ;;  %705 = vst [vmem:[%s1510_s3 + $0x128] sm:$0xff] %v535_v21 }
  0xe4   :  { %672 = vst [vmem:[%s1510_s3 + $0x20] sm:$0xff] %v370_v24  ;;  %704 = vst [vmem:[%s1510_s3 + $0x120] sm:$0xff] %v530_v25  ;;  %v880_v26 = vpop.f32.mrb[6].mxu0  ;;  %v928_v27 = vpop.f32.mrb[6].mxu1 }
  0xe5   :  { %v385_v28 = vadd.f32 %v880_v26, %v1249_v1  ;;  %v545_v29 = vadd.f32 %v928_v27, %v1249_v1  ;;  %v379_v30 = vpop.f32.mrb[7].mxu0  ;;  %v539_v31 = vpop.f32.mrb[7].mxu1 }
  0xe6   :  { %v380_v32 = vadd.f32 %v1249_v1, %v379_v30  ;;  %v540_v33 = vadd.f32 %v1249_v1, %v539_v31 }
  0xe7   :  { %675 = vst [vmem:[%s1510_s3 + $0x38] sm:$0xff] %v385_v28  ;;  %707 = vst [vmem:[%s1510_s3 + $0x138] sm:$0xff] %v545_v29 }
  0xe8   :  { %674 = vst [vmem:[%s1510_s3 + $0x30] sm:$0xff] %v380_v32  ;;  %706 = vst [vmem:[%s1510_s3 + $0x130] sm:$0xff] %v540_v33  ;;  %v883_v34 = vpop.f32.mrb[8].mxu0  ;;  %v931_v35 = vpop.f32.mrb[8].mxu1 }
  0xe9   :  { %v395_v36 = vadd.f32 %v883_v34, %v1249_v1  ;;  %v555_v37 = vadd.f32 %v931_v35, %v1249_v1  ;;  %v389_v38 = vpop.f32.mrb[9].mxu0  ;;  %v549_v39 = vpop.f32.mrb[9].mxu1 }
  0xea   :  { %v390_v40 = vadd.f32 %v1249_v1, %v389_v38  ;;  %v550_v41 = vadd.f32 %v1249_v1, %v549_v39 }
  0xeb   :  { %677 = vst [vmem:[%s1510_s3 + $0x48] sm:$0xff] %v395_v36  ;;  %709 = vst [vmem:[%s1510_s3 + $0x148] sm:$0xff] %v555_v37 }
  0xec   :  { %676 = vst [vmem:[%s1510_s3 + $0x40] sm:$0xff] %v390_v40  ;;  %708 = vst [vmem:[%s1510_s3 + $0x140] sm:$0xff] %v550_v41  ;;  %v886_v42 = vpop.f32.mrb[10].mxu0  ;;  %v934_v43 = vpop.f32.mrb[10].mxu1 }
  0xed   :  { %v405_v44 = vadd.f32 %v886_v42, %v1249_v1  ;;  %v565_v45 = vadd.f32 %v934_v43, %v1249_v1  ;;  %v399_v46 = vpop.f32.mrb[11].mxu0  ;;  %v559_v47 = vpop.f32.mrb[11].mxu1 }
  0xee   :  { %v400_v48 = vadd.f32 %v1249_v1, %v399_v46  ;;  %v560_v49 = vadd.f32 %v1249_v1, %v559_v47 }
  0xef   :  { %679 = vst [vmem:[%s1510_s3 + $0x58] sm:$0xff] %v405_v44  ;;  %711 = vst [vmem:[%s1510_s3 + $0x158] sm:$0xff] %v565_v45 }
  0xf0   :  { %678 = vst [vmem:[%s1510_s3 + $0x50] sm:$0xff] %v400_v48  ;;  %710 = vst [vmem:[%s1510_s3 + $0x150] sm:$0xff] %v560_v49  ;;  %v889_v50 = vpop.f32.mrb[12].mxu0  ;;  %v937_v51 = vpop.f32.mrb[12].mxu1 }
  0xf1   :  { %v415_v52 = vadd.f32 %v889_v50, %v1249_v1  ;;  %v575_v53 = vadd.f32 %v937_v51, %v1249_v1  ;;  %v409_v54 = vpop.f32.mrb[13].mxu0  ;;  %v569_v55 = vpop.f32.mrb[13].mxu1 }
  0xf2   :  { %v410_v56 = vadd.f32 %v1249_v1, %v409_v54  ;;  %v570_v57 = vadd.f32 %v1249_v1, %v569_v55 }
  0xf3   :  { %681 = vst [vmem:[%s1510_s3 + $0x68] sm:$0xff] %v415_v52  ;;  %713 = vst [vmem:[%s1510_s3 + $0x168] sm:$0xff] %v575_v53 }
  0xf4   :  { %680 = vst [vmem:[%s1510_s3 + $0x60] sm:$0xff] %v410_v56  ;;  %712 = vst [vmem:[%s1510_s3 + $0x160] sm:$0xff] %v570_v57  ;;  %v892_v58 = vpop.f32.mrb[14].mxu0  ;;  %v940_v59 = vpop.f32.mrb[14].mxu1 }
  0xf5   :  { %v425_v60 = vadd.f32 %v892_v58, %v1249_v1  ;;  %v585_v61 = vadd.f32 %v940_v59, %v1249_v1  ;;  %v419_v62 = vpop.f32.mrb[15].mxu0  ;;  %v579_v63 = vpop.f32.mrb[15].mxu1 }
  0xf6   :  { %v420_v0 = vadd.f32 %v1249_v1, %v419_v62  ;;  %v580_v2 = vadd.f32 %v1249_v1, %v579_v63 }
  0xf7   :  { %683 = vst [vmem:[%s1510_s3 + $0x78] sm:$0xff] %v425_v60  ;;  %715 = vst [vmem:[%s1510_s3 + $0x178] sm:$0xff] %v585_v61 }
  0xf8   :  { %682 = vst [vmem:[%s1510_s3 + $0x70] sm:$0xff] %v420_v0  ;;  %714 = vst [vmem:[%s1510_s3 + $0x170] sm:$0xff] %v580_v2  ;;  %v895_v3 = vpop.f32.mrb[16].mxu0  ;;  %v943_v4 = vpop.f32.mrb[16].mxu1 }
  0xf9   :  { %v435_v5 = vadd.f32 %v895_v3, %v1249_v1  ;;  %v595_v6 = vadd.f32 %v943_v4, %v1249_v1  ;;  %v429_v7 = vpop.f32.mrb[17].mxu0  ;;  %v589_v8 = vpop.f32.mrb[17].mxu1 }
  0xfa   :  { %v430_v9 = vadd.f32 %v1249_v1, %v429_v7  ;;  %v590_v10 = vadd.f32 %v1249_v1, %v589_v8 }
  0xfb   :  { %685 = vst [vmem:[%s1510_s3 + $0x88] sm:$0xff] %v435_v5  ;;  %717 = vst [vmem:[%s1510_s3 + $0x188] sm:$0xff] %v595_v6 }
  0xfc   :  { %684 = vst [vmem:[%s1510_s3 + $0x80] sm:$0xff] %v430_v9  ;;  %716 = vst [vmem:[%s1510_s3 + $0x180] sm:$0xff] %v590_v10  ;;  %v898_v11 = vpop.f32.mrb[18].mxu0  ;;  %v946_v12 = vpop.f32.mrb[18].mxu1 }
  0xfd   :  { %v445_v13 = vadd.f32 %v898_v11, %v1249_v1  ;;  %v605_v14 = vadd.f32 %v946_v12, %v1249_v1  ;;  %v439_v15 = vpop.f32.mrb[19].mxu0  ;;  %v599_v16 = vpop.f32.mrb[19].mxu1 }
  0xfe   :  { %v440_v17 = vadd.f32 %v1249_v1, %v439_v15  ;;  %v600_v18 = vadd.f32 %v1249_v1, %v599_v16 }
  0xff   :  { %687 = vst [vmem:[%s1510_s3 + $0x98] sm:$0xff] %v445_v13  ;;  %719 = vst [vmem:[%s1510_s3 + $0x198] sm:$0xff] %v605_v14 }
 0x100   :  { %686 = vst [vmem:[%s1510_s3 + $0x90] sm:$0xff] %v440_v17  ;;  %718 = vst [vmem:[%s1510_s3 + $0x190] sm:$0xff] %v600_v18  ;;  %v901_v19 = vpop.f32.mrb[20].mxu0  ;;  %v949_v20 = vpop.f32.mrb[20].mxu1 }
 0x101   :  { %v455_v21 = vadd.f32 %v901_v19, %v1249_v1  ;;  %v615_v22 = vadd.f32 %v949_v20, %v1249_v1  ;;  %v449_v23 = vpop.f32.mrb[21].mxu0  ;;  %v609_v24 = vpop.f32.mrb[21].mxu1 }
 0x102   :  { %v450_v25 = vadd.f32 %v1249_v1, %v449_v23  ;;  %v610_v26 = vadd.f32 %v1249_v1, %v609_v24 }
 0x103   :  { %689 = vst [vmem:[%s1510_s3 + $0xa8] sm:$0xff] %v455_v21  ;;  %721 = vst [vmem:[%s1510_s3 + $0x1a8] sm:$0xff] %v615_v22 }
 0x104   :  { %688 = vst [vmem:[%s1510_s3 + $0xa0] sm:$0xff] %v450_v25  ;;  %720 = vst [vmem:[%s1510_s3 + $0x1a0] sm:$0xff] %v610_v26  ;;  %v904_v27 = vpop.f32.mrb[22].mxu0  ;;  %v952_v28 = vpop.f32.mrb[22].mxu1 }
 0x105   :  { %v465_v29 = vadd.f32 %v904_v27, %v1249_v1  ;;  %v625_v30 = vadd.f32 %v952_v28, %v1249_v1  ;;  %v459_v31 = vpop.f32.mrb[23].mxu0  ;;  %v619_v32 = vpop.f32.mrb[23].mxu1 }
 0x106   :  { %v460_v33 = vadd.f32 %v1249_v1, %v459_v31  ;;  %v620_v34 = vadd.f32 %v1249_v1, %v619_v32 }
 0x107   :  { %691 = vst [vmem:[%s1510_s3 + $0xb8] sm:$0xff] %v465_v29  ;;  %723 = vst [vmem:[%s1510_s3 + $0x1b8] sm:$0xff] %v625_v30 }
 0x108   :  { %690 = vst [vmem:[%s1510_s3 + $0xb0] sm:$0xff] %v460_v33  ;;  %722 = vst [vmem:[%s1510_s3 + $0x1b0] sm:$0xff] %v620_v34  ;;  %v907_v35 = vpop.f32.mrb[24].mxu0  ;;  %v955_v36 = vpop.f32.mrb[24].mxu1 }
 0x109   :  { %v475_v37 = vadd.f32 %v907_v35, %v1249_v1  ;;  %v635_v38 = vadd.f32 %v955_v36, %v1249_v1  ;;  %v469_v39 = vpop.f32.mrb[25].mxu0  ;;  %v629_v40 = vpop.f32.mrb[25].mxu1 }
 0x10a   :  { %v470_v41 = vadd.f32 %v1249_v1, %v469_v39  ;;  %v630_v42 = vadd.f32 %v1249_v1, %v629_v40 }
 0x10b   :  { %693 = vst [vmem:[%s1510_s3 + $0xc8] sm:$0xff] %v475_v37  ;;  %725 = vst [vmem:[%s1510_s3 + $0x1c8] sm:$0xff] %v635_v38 }
 0x10c   :  { %692 = vst [vmem:[%s1510_s3 + $0xc0] sm:$0xff] %v470_v41  ;;  %724 = vst [vmem:[%s1510_s3 + $0x1c0] sm:$0xff] %v630_v42  ;;  %v910_v43 = vpop.f32.mrb[26].mxu0  ;;  %v958_v44 = vpop.f32.mrb[26].mxu1 }
 0x10d   :  { %v485_v45 = vadd.f32 %v910_v43, %v1249_v1  ;;  %v645_v46 = vadd.f32 %v958_v44, %v1249_v1  ;;  %v479_v47 = vpop.f32.mrb[27].mxu0  ;;  %v639_v48 = vpop.f32.mrb[27].mxu1 }
 0x10e   :  { %v480_v49 = vadd.f32 %v1249_v1, %v479_v47  ;;  %v640_v50 = vadd.f32 %v1249_v1, %v639_v48 }
 0x10f   :  { %695 = vst [vmem:[%s1510_s3 + $0xd8] sm:$0xff] %v485_v45  ;;  %727 = vst [vmem:[%s1510_s3 + $0x1d8] sm:$0xff] %v645_v46 }
 0x110   :  { %694 = vst [vmem:[%s1510_s3 + $0xd0] sm:$0xff] %v480_v49  ;;  %726 = vst [vmem:[%s1510_s3 + $0x1d0] sm:$0xff] %v640_v50  ;;  %v913_v51 = vpop.f32.mrb[28].mxu0  ;;  %v961_v52 = vpop.f32.mrb[28].mxu1 }
 0x111   :  { %v495_v53 = vadd.f32 %v913_v51, %v1249_v1  ;;  %v655_v54 = vadd.f32 %v961_v52, %v1249_v1  ;;  %v489_v55 = vpop.f32.mrb[29].mxu0  ;;  %v649_v56 = vpop.f32.mrb[29].mxu1 }
 0x112   :  { %v490_v57 = vadd.f32 %v1249_v1, %v489_v55  ;;  %v650_v58 = vadd.f32 %v1249_v1, %v649_v56 }
 0x113   :  { %697 = vst [vmem:[%s1510_s3 + $0xe8] sm:$0xff] %v495_v53  ;;  %729 = vst [vmem:[%s1510_s3 + $0x1e8] sm:$0xff] %v655_v54 }
 0x114   :  { %696 = vst [vmem:[%s1510_s3 + $0xe0] sm:$0xff] %v490_v57  ;;  %728 = vst [vmem:[%s1510_s3 + $0x1e0] sm:$0xff] %v650_v58  ;;  %v916_v59 = vpop.f32.mrb[30].mxu0  ;;  %v964_v60 = vpop.f32.mrb[30].mxu1 }
 0x115   :  { %v505_v61 = vadd.f32 %v916_v59, %v1249_v1  ;;  %v665_v62 = vadd.f32 %v964_v60, %v1249_v1  ;;  %v499_v63 = vpop.f32.mrb[31].mxu0  ;;  %v659_v0 = vpop.f32.mrb[31].mxu1 }
 0x116   :  { %v500_v2 = vadd.f32 %v1249_v1, %v499_v63  ;;  %v660_v3 = vadd.f32 %v1249_v1, %v659_v0 }
 0x117   :  { %699 = vst [vmem:[%s1510_s3 + $0xf8] sm:$0xff] %v505_v61  ;;  %731 = vst [vmem:[%s1510_s3 + $0x1f8] sm:$0xff] %v665_v62 }
 0x118   :  { %698 = vst [vmem:[%s1510_s3 + $0xf0] sm:$0xff] %v500_v2  ;;  %730 = vst [vmem:[%s1510_s3 + $0x1f0] sm:$0xff] %v660_v3 }

</bundles_post_ra>
